<compile_context>
chip_gen: v7x
topology: tpu7x:2x2x1
jax: 0.10.0
libtpu: 0.0.40
codegen_flags: <defaults>
</compile_context>

<pallas_src>
import jax
import jax.numpy as jnp
from jax.experimental import pallas as pl
from jax.experimental.pallas import tpu as pltpu


_PALLAS_MIN_ROWS = 1024   # below this, fused XLA slices beat pallas_call launch cost
_BN_CAP = 2048            # rows per grid step; VMEM-safe on v5e/v6e/v7x (see header)

_KERNEL_CHOICE = {}       # dtype name -> (kernel_fn, needs_padded_scratch)


def _round_up(n, m):
    return ((n + m - 1) // m) * m


def _split_kernel_direct(x_ref, o0_ref, o1_ref, o2_ref):
    # x_ref: (bn, 3); outputs: three lane-dense (1, bn) blocks.
    # Direct minor-dim transpose -- Mosaic picks the minimal relayout.
    t = jnp.transpose(x_ref[...])          # (3, bn)
    o0_ref[...] = t[0:1, :]
    o1_ref[...] = t[1:2, :]
    o2_ref[...] = t[2:3, :]


def _split_kernel_padded(x_ref, o0_ref, o1_ref, o2_ref, pad_ref):
    # Fallback: stage the 3 real lanes into a zero-initialised (bn, 128)
    # scratch and do a natively tile-aligned (bn,128)->(128,bn) transpose.
    # (Zeroing removes the uninitialised-lane read flagged in review.)
    pad_ref[...] = jnp.zeros_like(pad_ref)
    pad_ref[:, 0:3] = x_ref[...]
    t = jnp.transpose(pad_ref[...])         # (128, bn)
    o0_ref[...] = t[0:1, :]
    o1_ref[...] = t[1:2, :]
    o2_ref[...] = t[2:3, :]


def _build_split_call(kern, needs_scratch, Np, bn, dt):
    scratch = [pltpu.VMEM((bn, 128), dt)] if needs_scratch else []
    return pl.pallas_call(
        kern,
        out_shape=tuple(jax.ShapeDtypeStruct((1, Np), dt) for _ in range(3)),
        grid=(Np // bn,),
        in_specs=[pl.BlockSpec((bn, 3), lambda i: (i, 0))],
        out_specs=tuple(pl.BlockSpec((1, bn), lambda i: (0, i)) for _ in range(3)),
        scratch_shapes=scratch,
        compiler_params=pltpu.CompilerParams(
            dimension_semantics=("parallel",)),
    )


def _select_kernel(dt):
    """Probe the direct (bn,3)->(3,bn) transpose once; fall back if needed."""
    key = jnp.dtype(dt).name
    if key in _KERNEL_CHOICE:
        return _KERNEL_CHOICE[key]
    choice = (_split_kernel_padded, True)
    try:
        probe = jnp.arange(128 * 3, dtype=dt).reshape(128, 3)
        outs = _build_split_call(_split_kernel_direct, False, 128, 128, dt)(probe)
        ref = jnp.transpose(probe)
        if all(bool(jnp.array_equal(outs[w][0], ref[w])) for w in range(3)):
            choice = (_split_kernel_direct, False)
    except Exception:
        choice = (_split_kernel_padded, True)
    _KERNEL_CHOICE[key] = choice
    return choice


def _pallas_splits(v1):
    B, C, H, _ = v1.shape
    dt = v1.dtype
    N = B * C * H
    x2 = v1.reshape(N, 3)                   # free, contiguous (b,c,h)-row view

    Np128 = _round_up(N, 128)
    bn = min(_BN_CAP, Np128)
    # Prefer >=2 grid steps (pipelining; v7x megacore) when it costs no padding.
    if Np128 == bn and bn >= 256 and (bn // 2) % 128 == 0:
        bn //= 2
    Np = _round_up(N, bn)
    if Np != N:
        x2 = jnp.pad(x2, ((0, Np - N), (0, 0)))   # padded/masked tail, never bn=N

    kern, needs_scratch = _select_kernel(dt)
    o0, o1, o2 = _build_split_call(kern, needs_scratch, Np, bn, dt)(x2)

    def _finish(o):
        row = o.reshape(-1)                 # (Np,) -- same linear order, no copy
        if Np != N:
            row = row[:N]                   # small copy only for ragged N
        return row.reshape(B, C, H, 1)      # pure reshape: no copy

    return tuple(_finish(o) for o in (o0, o1, o2))


def model_forward(v1, force_pallas=False):
    """Returns (concatenated_tensor, (split0, split1, split2)) like the torch Model."""
    B, C, H, W = v1.shape
    assert W == 3, "torch.split(v1, [1, 1, 1], dim=3) requires size 3 on dim 3"

    # torch.cat(torch.split(v1, [1,1,1], 3), 3) == v1: return it with no copy.
    concatenated = v1

    N = B * C * H
    if not force_pallas and N < _PALLAS_MIN_ROWS:
        # Launch overhead dominates at this size: let XLA fuse three slices.
        splits = tuple(jax.lax.slice_in_dim(v1, w, w + 1, axis=3) for w in range(3))
        return concatenated, splits

    return concatenated, _pallas_splits(v1)


def _init_unused_conv_params(key):
    # Conv2d(3, 32, 5, 1, 2) and Conv2d(32, 32, 3, 1, 1) -- defined in __init__
    # but never used by forward(); built here only for shape parity.
    k1, k2, k3, k4 = jax.random.split(key, 4)
    w1 = jax.random.normal(k1, (32, 3, 5, 5), jnp.float32) * 0.01
    b1 = jax.random.normal(k2, (32,), jnp.float32) * 0.01
    w2 = jax.random.normal(k3, (32, 32, 3, 3), jnp.float32) * 0.01
    b2 = jax.random.normal(k4, (32,), jnp.float32) * 0.01
    return (w1, b1), (w2, b2)


if __name__ == "__main__":
    key = jax.random.PRNGKey(0)
    k1, k2, k3, kp = jax.random.split(key, 4)

    _ = _init_unused_conv_params(kp)    # unused by forward(), kept for parity

    def check(x, force_pallas):
        concat, splits = model_forward(x, force_pallas=force_pallas)
        jax.block_until_ready(concat)
        jax.block_until_ready(splits)
        assert concat.shape == x.shape
        assert jnp.array_equal(concat, x)
        assert len(splits) == 3
        for w, s in enumerate(splits):
            assert s.shape == x.shape[:3] + (1,)
            assert jnp.array_equal(s, jax.lax.slice_in_dim(x, w, w + 1, axis=3))

    # 1) Small demo shape (B=2, C=4, H=16, W=3): auto-dispatches to the fused
    #    XLA slice path (review: skip Pallas where launch overhead dominates).
    check(jax.random.normal(k1, (2, 4, 16, 3), jnp.float32), force_pallas=False)

    # 2) Larger shape (N = 4096): Pallas path, bn=2048, 2-step parallel grid.
    check(jax.random.normal(k2, (4, 8, 128, 3), jnp.float32), force_pallas=False)

    # 3) Ragged N = 240 (not a multiple of 128), forced through Pallas to
    #    exercise the padded-tail handling and a 2-step grid with bn=128.
    check(jax.random.normal(k3, (2, 3, 40, 3), jnp.float32), force_pallas=True)

    print("KERNEL_OK")
</pallas_src>

<mosaic_0001>
module attributes {stable_mosaic.version = 11 : i64} {
  func.func @_split_kernel_direct(%arg0: i32, %arg1: memref<128x3xf32, #tpu.memory_space<vmem>>, %arg2: memref<1x128xf32, #tpu.memory_space<vmem>>, %arg3: memref<1x128xf32, #tpu.memory_space<vmem>>, %arg4: memref<1x128xf32, #tpu.memory_space<vmem>>) attributes {dimension_semantics = [#tpu.dimension_semantics<parallel>], iteration_bounds = array<i64: 1>, scalar_prefetch = 0 : i64, scratch_operands = 0 : i64, tpu.core_type = #tpu.core_type<tc>, window_params = [{transform_indices = @transform_0, window_bounds = array<i64: 128, 3>}, {transform_indices = @transform_1, window_bounds = array<i64: 1, 128>}, {transform_indices = @transform_2, window_bounds = array<i64: 1, 128>}, {transform_indices = @transform_3, window_bounds = array<i64: 1, 128>}]} {
    %c0 = arith.constant 0 : index
    %c0_0 = arith.constant 0 : index
    %0 = vector.load %arg1[%c0, %c0_0] : memref<128x3xf32, #tpu.memory_space<vmem>>, vector<128x3xf32>
    %1 = tpu.transpose %0, [1, 0] : vector<128x3xf32> -> vector<3x128xf32>
    %2 = vector.extract_strided_slice %1 {offsets = [0, 0], sizes = [1, 128], strides = [1, 1]} : vector<3x128xf32> to vector<1x128xf32>
    %c0_1 = arith.constant 0 : index
    %c0_2 = arith.constant 0 : index
    %3 = vector.load %arg2[%c0_1, %c0_2] : memref<1x128xf32, #tpu.memory_space<vmem>>, vector<1x128xf32>
    tpu.vector_store %arg2[%c0_1, %c0_2], %2 {strides = array<i32>} : memref<1x128xf32, #tpu.memory_space<vmem>>, vector<1x128xf32>,
    %4 = vector.extract_strided_slice %1 {offsets = [1, 0], sizes = [1, 128], strides = [1, 1]} : vector<3x128xf32> to vector<1x128xf32>
    %c0_3 = arith.constant 0 : index
    %c0_4 = arith.constant 0 : index
    %5 = vector.load %arg3[%c0_3, %c0_4] : memref<1x128xf32, #tpu.memory_space<vmem>>, vector<1x128xf32>
    tpu.vector_store %arg3[%c0_3, %c0_4], %4 {strides = array<i32>} : memref<1x128xf32, #tpu.memory_space<vmem>>, vector<1x128xf32>,
    %6 = vector.extract_strided_slice %1 {offsets = [2, 0], sizes = [1, 128], strides = [1, 1]} : vector<3x128xf32> to vector<1x128xf32>
    %c0_5 = arith.constant 0 : index
    %c0_6 = arith.constant 0 : index
    %7 = vector.load %arg4[%c0_5, %c0_6] : memref<1x128xf32, #tpu.memory_space<vmem>>, vector<1x128xf32>
    tpu.vector_store %arg4[%c0_5, %c0_6], %6 {strides = array<i32>} : memref<1x128xf32, #tpu.memory_space<vmem>>, vector<1x128xf32>,
    return
  }
  func.func @transform_0(%arg0: i32) -> (i32, i32) {
    %c0_i32 = arith.constant 0 : i32
    %c0_i32_0 = arith.constant 0 : i32
    return %arg0, %c0_i32 : i32, i32
  }
  func.func @transform_1(%arg0: i32) -> (i32, i32) {
    %c0_i32 = arith.constant 0 : i32
    %c0_i32_0 = arith.constant 0 : i32
    return %c0_i32, %arg0 : i32, i32
  }
  func.func @transform_2(%arg0: i32) -> (i32, i32) {
    %c0_i32 = arith.constant 0 : i32
    %c0_i32_0 = arith.constant 0 : i32
    return %c0_i32, %arg0 : i32, i32
  }
  func.func @transform_3(%arg0: i32) -> (i32, i32) {
    %c0_i32 = arith.constant 0 : i32
    %c0_i32_0 = arith.constant 0 : i32
    return %c0_i32, %arg0 : i32, i32
  }
}

module attributes {stable_mosaic.version = 11 : i64} {
  func.func @_split_kernel_padded(%arg0: i32, %arg1: memref<2048x3xf32, #tpu.memory_space<vmem>>, %arg2: memref<1x2048xf32, #tpu.memory_space<vmem>>, %arg3: memref<1x2048xf32, #tpu.memory_space<vmem>>, %arg4: memref<1x2048xf32, #tpu.memory_space<vmem>>, %arg5: memref<2048x128xf32, #tpu.memory_space<vmem>>) attributes {dimension_semantics = [#tpu.dimension_semantics<parallel>], iteration_bounds = array<i64: 2>, scalar_prefetch = 0 : i64, scratch_operands = 1 : i64, tpu.core_type = #tpu.core_type<tc>, window_params = [{transform_indices = @transform_0, window_bounds = array<i64: 2048, 3>}, {transform_indices = @transform_1, window_bounds = array<i64: 1, 2048>}, {transform_indices = @transform_2, window_bounds = array<i64: 1, 2048>}, {transform_indices = @transform_3, window_bounds = array<i64: 1, 2048>}]} {
    %cst = arith.constant 0.000000e+00 : f32
    %0 = vector.broadcast %cst : f32 to vector<2048x128xf32>
    %c0 = arith.constant 0 : index
    %c0_0 = arith.constant 0 : index
    %1 = vector.load %arg5[%c0, %c0_0] : memref<2048x128xf32, #tpu.memory_space<vmem>>, vector<2048x128xf32>
    tpu.vector_store %arg5[%c0, %c0_0], %0 {strides = array<i32>} : memref<2048x128xf32, #tpu.memory_space<vmem>>, vector<2048x128xf32>,
    %c0_1 = arith.constant 0 : index
    %c0_2 = arith.constant 0 : index
    %2 = vector.load %arg1[%c0_1, %c0_2] : memref<2048x3xf32, #tpu.memory_space<vmem>>, vector<2048x3xf32>
    %c0_3 = arith.constant 0 : index
    %c0_4 = arith.constant 0 : index
    %3 = vector.load %arg5[%c0_3, %c0_4] : memref<2048x128xf32, #tpu.memory_space<vmem>>, vector<2048x3xf32>
    tpu.vector_store %arg5[%c0_3, %c0_4], %2 {strides = array<i32>} : memref<2048x128xf32, #tpu.memory_space<vmem>>, vector<2048x3xf32>,
    %c0_5 = arith.constant 0 : index
    %c0_6 = arith.constant 0 : index
    %4 = vector.load %arg5[%c0_5, %c0_6] : memref<2048x128xf32, #tpu.memory_space<vmem>>, vector<2048x128xf32>
    %5 = tpu.transpose %4, [1, 0] : vector<2048x128xf32> -> vector<128x2048xf32>
    %6 = vector.extract_strided_slice %5 {offsets = [0, 0], sizes = [1, 2048], strides = [1, 1]} : vector<128x2048xf32> to vector<1x2048xf32>
    %c0_7 = arith.constant 0 : index
    %c0_8 = arith.constant 0 : index
    %7 = vector.load %arg2[%c0_7, %c0_8] : memref<1x2048xf32, #tpu.memory_space<vmem>>, vector<1x2048xf32>
    tpu.vector_store %arg2[%c0_7, %c0_8], %6 {strides = array<i32>} : memref<1x2048xf32, #tpu.memory_space<vmem>>, vector<1x2048xf32>,
    %8 = vector.extract_strided_slice %5 {offsets = [1, 0], sizes = [1, 2048], strides = [1, 1]} : vector<128x2048xf32> to vector<1x2048xf32>
    %c0_9 = arith.constant 0 : index
    %c0_10 = arith.constant 0 : index
    %9 = vector.load %arg3[%c0_9, %c0_10] : memref<1x2048xf32, #tpu.memory_space<vmem>>, vector<1x2048xf32>
    tpu.vector_store %arg3[%c0_9, %c0_10], %8 {strides = array<i32>} : memref<1x2048xf32, #tpu.memory_space<vmem>>, vector<1x2048xf32>,
    %10 = vector.extract_strided_slice %5 {offsets = [2, 0], sizes = [1, 2048], strides = [1, 1]} : vector<128x2048xf32> to vector<1x2048xf32>
    %c0_11 = arith.constant 0 : index
    %c0_12 = arith.constant 0 : index
    %11 = vector.load %arg4[%c0_11, %c0_12] : memref<1x2048xf32, #tpu.memory_space<vmem>>, vector<1x2048xf32>
    tpu.vector_store %arg4[%c0_11, %c0_12], %10 {strides = array<i32>} : memref<1x2048xf32, #tpu.memory_space<vmem>>, vector<1x2048xf32>,
    return
  }
  func.func @transform_0(%arg0: i32) -> (i32, i32) {
    %c0_i32 = arith.constant 0 : i32
    %c0_i32_0 = arith.constant 0 : i32
    return %arg0, %c0_i32 : i32, i32
  }
  func.func @transform_1(%arg0: i32) -> (i32, i32) {
    %c0_i32 = arith.constant 0 : i32
    %c0_i32_0 = arith.constant 0 : i32
    return %c0_i32, %arg0 : i32, i32
  }
  func.func @transform_2(%arg0: i32) -> (i32, i32) {
    %c0_i32 = arith.constant 0 : i32
    %c0_i32_0 = arith.constant 0 : i32
    return %c0_i32, %arg0 : i32, i32
  }
  func.func @transform_3(%arg0: i32) -> (i32, i32) {
    %c0_i32 = arith.constant 0 : i32
    %c0_i32_0 = arith.constant 0 : i32
    return %c0_i32, %arg0 : i32, i32
  }
}

</mosaic_0001>

<bundles_post_ra>
// kernel: tpu_custom_call.1
= control target key start
LH: loop header
LB: loop body
LE: loop exit
PB: predicated region body
PF: predicated region fallthrough
CT: control target
= control target key end

     0   :  { %9 = vsyncpa [#allocation3], 0  ;;  %s301_s0 = inlined_call_operand.vmem [shape: f32[128,3], index: 0, kind: input, shape index: {}]   ;;  %s302_s1 = inlined_call_operand.hbm [shape: f32[1,128], index: 1, kind: output, shape index: {0}]   ;;  %s303_s2 = inlined_call_operand.hbm [shape: f32[1,128], index: 2, kind: output, shape index: {1}]   ;;  %s304_s3 = inlined_call_operand.hbm [shape: f32[1,128], index: 3, kind: output, shape index: {2}]  }
   0x1   :  { %v13_v0 = vld [vmem:[%s301_s0] sm:$0xff]  ;;  %v14_v1 = vld [vmem:[%s301_s0 + $0x8] sm:$0xff] }
   0x2   :  { %29 = vxpose.xlu0.b32.start [1/16] (narrow) %v13_v0, 8 }
   0x6   :  { %30 = vxpose.xlu0.b32.cont [2/16] (narrow) %v14_v1, 8 }
   0x7   :  { %10 = vsyncpa [#allocation5], 0  ;;  %v15_v2 = vld [vmem:[%s301_s0 + $0x10] sm:$0xff]  ;;  %v16_v3 = vld [vmem:[%s301_s0 + $0x18] sm:$0xff]  ;;  %s178_s17 = smov [#allocation4]   ;;  %s179_s19 = smov [#allocation2]  }
   0x8   :  { %v17_v4 = vld [vmem:[%s301_s0 + $0x20] sm:$0xff]  ;;  %v18_v5 = vld [vmem:[%s301_s0 + $0x28] sm:$0xff]  ;;  %v19_v6 = vld [vmem:[%s301_s0 + $0x30] sm:$0xff]  ;;  %s80_s18 = sshll.u32 %s178_s17, 4  ;;  %s70_s20 = sshll.u32 %s179_s19, 4  ;;  %s81_s18 = int_to_ptr.vmem [resolvable:$true] %s80_s18  ;;  %s249_s20 = int_to_ptr.vmem [resolvable:$true] %s70_s20 }
   0x9   :  { %v20_v7 = vld [vmem:[%s301_s0 + $0x38] sm:$0xff]  ;;  %v21_v8 = vld [vmem:[%s301_s0 + $0x40] sm:$0xff]  ;;  %v22_v9 = vld [vmem:[%s301_s0 + $0x48] sm:$0xff]  ;;  %s180_s21 = smov [#allocation6]   ;;  %s108_s23 = scalar_lea.vmem %s81_s18, 16 }
   0xa   :  { %31 = vxpose.xlu0.b32.cont [3/16] (narrow) %v15_v2, 8  ;;  %v23_v10 = vld [vmem:[%s301_s0 + $0x50] sm:$0xff]  ;;  %v24_v11 = vld [vmem:[%s301_s0 + $0x58] sm:$0xff]  ;;  %v25_v12 = vld [vmem:[%s301_s0 + $0x60] sm:$0xff]  ;;  %s90_s22 = sshll.u32 %s180_s21, 4  ;;  %p109_p0 = scmp.ne.s32.totalorder %s81_s18, %s108_s23  ;;  %s251_s22 = int_to_ptr.vmem [resolvable:$true] %s90_s22 }
   0xb   :  { %v26_v13 = vld [vmem:[%s301_s0 + $0x68] sm:$0xff]  ;;  %v27_v14 = vld [vmem:[%s301_s0 + $0x70] sm:$0xff]  ;;  %v28_v15 = vld [vmem:[%s301_s0 + $0x78] sm:$0xff]  ;;  %s112_s24 = scalar_lea.vmem %s81_s18, 32  ;;  %p113_p1 = scmp.lt.s32.totalorder %s81_s18, %s81_s18 }
   0xc   :  { %p114_p2 = scmp.lt.s32.totalorder %s112_s24, %s108_s23 }
   0xe   :  { %32 = vxpose.xlu0.b32.cont [4/16] (narrow) %v16_v3, 8  ;;  %p115_p3 = por %p114_p2, %p113_p1 }
  0x10   :  { %p116_p4 = pnand %p115_p3, %p109_p0 }
  0x12   :  { %33 = vxpose.xlu0.b32.cont [5/16] (narrow) %v17_v4, 8 }
  0x16   :  { %34 = vxpose.xlu0.b32.cont [6/16] (narrow) %v18_v5, 8 }
  0x1a   :  { %35 = vxpose.xlu0.b32.cont [7/16] (narrow) %v19_v6, 8 }
  0x1e   :  { %36 = vxpose.xlu0.b32.cont [8/16] (narrow) %v20_v7, 8 }
  0x22   :  { %37 = vxpose.xlu0.b32.cont [9/16] (narrow) %v21_v8, 8 }
  0x26   :  { %38 = vxpose.xlu0.b32.cont [10/16] (narrow) %v22_v9, 8 }
  0x2a   :  { %39 = vxpose.xlu0.b32.cont [11/16] (narrow) %v23_v10, 8 }
  0x2e   :  { %40 = vxpose.xlu0.b32.cont [12/16] (narrow) %v24_v11, 8 }
  0x32   :  { %41 = vxpose.xlu0.b32.cont [13/16] (narrow) %v25_v12, 8 }
  0x36   :  { %42 = vxpose.xlu0.b32.cont [14/16] (narrow) %v26_v13, 8 }
  0x3a   :  { %43 = vxpose.xlu0.b32.cont [15/16] (narrow) %v27_v14, 8 }
  0x3e   :  { %44 = vxpose.xlu0.b32.end [16/16] (narrow) %v28_v15, 8 }
  0x82   :  { %v45_v16 = vpop.trf.xlu0 }
  0x83   :  { %61 = vst [vmem:[#allocation2] sm:$0x1] %v45_v16  ;;  %62 = vst [vmem:[#allocation4 - $0x1] sm:$0x2] %v45_v16 }
  0x84   :  { %63 = vst [vmem:[#allocation6 - $0x2] sm:$0x4] %v45_v16 }
  0x85   :  { %119 = shalt.err (!%p116_p4)
}
  0x86   :  { %s120_s26 = scalar_lea.hbm %s303_s2, 16 }
  0x87   :  { %p121_p5 = scmp.ne.s32.totalorder %s303_s2, %s120_s26  ;;  %p124_p6 = scmp.lt.u32.totalorder %s120_s26, %s303_s2 }
  0x89   :  { %p126_p7 = pnand %p124_p6, %p121_p5 }
  0x8b   :  { %129 = shalt.err (!%p126_p7)
}
  0x8c   :  { %83 = dma.vmem_to_hbm [thread:$0]  %s81_s18, 16, %s303_s2, [#allocation5]  }
  0x8d   :  { %s130_s6 = scalar_lea.vmem %s249_s20, 16  ;;  %s134_s7 = scalar_lea.vmem %s249_s20, 32 }
  0x8e   :  { %p131_p8 = scmp.ne.s32.totalorder %s249_s20, %s130_s6  ;;  %p135_p9 = scmp.lt.s32.totalorder %s249_s20, %s249_s20 }
  0x8f   :  { %p136_p10 = scmp.lt.s32.totalorder %s134_s7, %s130_s6 }
  0x91   :  { %p137_p11 = por %p136_p10, %p135_p9 }
  0x93   :  { %p138_p12 = pnand %p137_p11, %p131_p8 }
  0x95   :  { %141 = shalt.err (!%p138_p12)
}
  0x96   :  { %s142_s10 = scalar_lea.hbm %s302_s1, 16 }
  0x97   :  { %p143_p13 = scmp.ne.s32.totalorder %s302_s1, %s142_s10  ;;  %p146_p0 = scmp.lt.u32.totalorder %s142_s10, %s302_s1 }
  0x99   :  { %p148_p1 = pnand %p146_p0, %p143_p13 }
  0x9b   :  { %151 = shalt.err (!%p148_p1)
}
  0x9c   :  { %73 = dma.vmem_to_hbm [thread:$0]  %s249_s20, 16, %s302_s1, [#allocation3]  }
  0x9d   :  { %s152_s16 = scalar_lea.vmem %s251_s22, 16  ;;  %s156_s17 = scalar_lea.vmem %s251_s22, 32 }
  0x9e   :  { %p153_p2 = scmp.ne.s32.totalorder %s251_s22, %s152_s16  ;;  %p157_p3 = scmp.lt.s32.totalorder %s251_s22, %s251_s22 }
  0x9f   :  { %p158_p4 = scmp.lt.s32.totalorder %s156_s17, %s152_s16 }
  0xa1   :  { %p159_p5 = por %p158_p4, %p157_p3 }
  0xa3   :  { %p160_p6 = pnand %p159_p5, %p153_p2 }
  0xa5   :  { %163 = shalt.err (!%p160_p6)
}
  0xa6   :  { %s164_s21 = scalar_lea.hbm %s304_s3, 16 }
  0xa7   :  { %p165_p7 = scmp.ne.s32.totalorder %s304_s3, %s164_s21  ;;  %p168_p8 = scmp.lt.u32.totalorder %s164_s21, %s304_s3 }
  0xa9   :  { %p170_p9 = pnand %p168_p8, %p165_p7 }
  0xab   :  { %173 = shalt.err (!%p170_p9)
}
  0xac   :  { %93 = dma.vmem_to_hbm [thread:$0]  %s251_s22, 16, %s304_s3, [#allocation5]  }
  0xad   :  { %174 = dma.done.wait [#allocation3], 16  }
  0xae   :  { %175 = vsyncadd [#allocation3], 4294967280 }
  0xaf   :  { %176 = dma.done.wait [#allocation5], 32  }
  0xb0   :  { %177 = vsyncadd [#allocation5], 4294967264 }
  0xb1   :  { %103 = vsyncpa [#allocation3], 1 }
  0xb2   :  { %104 = vsyncpa [#allocation5], 1 }

// kernel: tpu_custom_call.1
= control target key start
LH: loop header
LB: loop body
LE: loop exit
PB: predicated region body
PF: predicated region fallthrough
CT: control target
= control target key end

     0   :  { %9 = vsyncpa [#allocation4], 0  ;;  %s3266_s0 = inlined_call_operand.vmem [shape: f32[4096,3], index: 0, kind: input, shape index: {}]   ;;  %s3267_s1 = inlined_call_operand.hbm [shape: f32[1,4096], index: 1, kind: output, shape index: {0}]   ;;  %s3268_s2 = inlined_call_operand.hbm [shape: f32[1,4096], index: 2, kind: output, shape index: {1}]   ;;  %s3269_s3 = inlined_call_operand.hbm [shape: f32[1,4096], index: 3, kind: output, shape index: {2}]  }
   0x1   :  { %11 = vsyncpa [#allocation4 + $0x1], 0 }
   0x2   :  { %12 = vsyncpa [#allocation6], 0 }
   0x3   :  { %14 = vsyncpa [#allocation6 + $0x1], 0  ;;  %s2287_s12 = smov 0   ;;  %s2289_s13 = smov 0  }
   0x4   :  { %s2291_s14 = smov 0   ;;  %s2293_s15 = smov 0  }
   0x5 LB: > { %s2308_s16 = sadd.s32 4294967295, %s2260_s15   ;;  %s2064_s17 = sadd.s32 4294967294, %s2260_s15   ;;  %s2260_s15 = sphi %s2293_s15, %s3275_s15   ;;  %s2256_s14 = sphi %s2291_s14, %s3274_s14   ;;  %s2252_s13 = sphi %s2289_s13, %s3273_s13   ;;  %s2248_s12 = sphi %s2287_s12, %s3272_s12  }
   0x6   : > { %s2312_s18 = sadd.s32 1, %s2260_s15   ;;  %s53_s19 = sadd.s32 1, %s2256_s14 }
   0x7   : > { %s50_s20 = ssub.s32 %s2260_s15, %s2312_s18  ;;  %p63_p0 = scmp.ne.s32.totalorder %s2256_s14, %s2252_s13 }
   0x8   : > { %p51_p1 = scmp.eq.s32.totalorder %s50_s20, 0  ;;  %p64_p2 = scmp.eq.s32.totalorder %s2308_s16, 1 }
   0x9   : > { %p69_p3 = scmp.ne.s32.totalorder %s2252_s13, %s2248_s12  ;;  %p70_p4 = scmp.eq.s32.totalorder %s2064_s17, 1 }
   0xa   : > { %s2325_s21 = scalar_select %p51_p1, %s2256_s14, %s53_s19  }
   0xb   : > { %p2327_p5 = por %p64_p2, %p63_p0  ;;  %p2331_p6 = por %p70_p4, %p69_p3 }
   0xc   : > { %p2067_p7 = scmp.ge.s32.totalorder %s2260_s15, 1  ;;  %p149_p8 = scmp.lt.s32.totalorder %s2260_s15, 3 }
   0xe   : > { %p150_p9 = pnand %p2067_p7, %p149_p8 }
   0xf   : > { %s2338_s24 = sshll.u32 (!%p150_p9), %s2308_s16, 8  ;;  %v2262_v0 = vmov (!%p150_p9), 0.0   ;;  %vm704_vm0 = vcmask (!%p150_p9), 23552   ;;  %s166_s30 = sand.u32 (!%p150_p9), 1, %s2252_s13  }
  0x10   : > { %153 = sbr.rel (%p150_p9) target bundleno = 805 (0x325), region = 24  ;;  %p184_p10 = scmp.lt.s32.totalorder (!%p150_p9), %s2338_s24, 511  ;;  %208 = vst [vmem:[#allocation2 + $0x80] sm:$0xff] (!%p150_p9), %v2262_v0  ;;  %192 = vst [vmem:[#allocation2] sm:$0xff] (!%p150_p9), %v2262_v0 }
  0x11   : > { %193 = vst [vmem:[#allocation2 + $0x8] sm:$0xff] (!%p150_p9), %v2262_v0  ;;  %194 = vst [vmem:[#allocation2 + $0x10] sm:$0xff] (!%p150_p9), %v2262_v0  ;;  %s2068_s4 = sshll.u32 (!%p150_p9), %s166_s30, 4  ;;  %s1896_s8 = sand.u32 (!%p150_p9), 1, %s2308_s16  }
  0x12   : > { %195 = vst [vmem:[#allocation2 + $0x18] sm:$0xff] (!%p150_p9), %v2262_v0  ;;  %196 = vst [vmem:[#allocation2 + $0x20] sm:$0xff] (!%p150_p9), %v2262_v0  ;;  %s3130_s5 = scalar_lea.vmem (!%p150_p9), [#allocation5], %s2068_s4  ;;  %s3133_s6 = scalar_lea.vmem (!%p150_p9), [#allocation3], %s2068_s4 }
  0x13   : > { %197 = vst [vmem:[#allocation2 + $0x28] sm:$0xff] (!%p150_p9), %v2262_v0  ;;  %198 = vst [vmem:[#allocation2 + $0x30] sm:$0xff] (!%p150_p9), %v2262_v0  ;;  %s3136_s7 = scalar_lea.vmem (!%p150_p9), [#allocation7], %s2068_s4  ;;  %s1930_s9 = sshll.u32 (!%p150_p9), %s3130_s5, 4  ;;  %s3157_s9 = int_to_ptr.vmem [resolvable:$true] %s1930_s9 }
  0x14   : > { %199 = vst [vmem:[#allocation2 + $0x38] sm:$0xff] (!%p150_p9), %v2262_v0  ;;  %200 = vst [vmem:[#allocation2 + $0x40] sm:$0xff] (!%p150_p9), %v2262_v0  ;;  %s1916_s10 = sshll.u32 (!%p150_p9), %s3133_s6, 4  ;;  %s3154_s16 = scalar_lea.hbm (!%p150_p9), %s3268_s2, %s2338_s24  ;;  %s3165_s10 = int_to_ptr.vmem [resolvable:$true] %s1916_s10 }
  0x15   : > { %201 = vst [vmem:[#allocation2 + $0x48] sm:$0xff] (!%p150_p9), %v2262_v0  ;;  %202 = vst [vmem:[#allocation2 + $0x50] sm:$0xff] (!%p150_p9), %v2262_v0  ;;  %s1944_s20 = sshll.u32 (!%p150_p9), %s3136_s7, 4  ;;  %s3163_s27 = scalar_lea.hbm (!%p150_p9), %s3267_s1, %s2338_s24  ;;  %s3176_s20 = int_to_ptr.vmem [resolvable:$true] %s1944_s20 }
  0x16   : > { %203 = vst [vmem:[#allocation2 + $0x58] sm:$0xff] (!%p150_p9), %v2262_v0  ;;  %204 = vst [vmem:[#allocation2 + $0x60] sm:$0xff] (!%p150_p9), %v2262_v0  ;;  %s3174_s4 = scalar_lea.hbm (!%p150_p9), %s3269_s3, %s2338_s24  ;;  %s3178_s11 = scalar_lea.sflag (!%p150_p9), [#allocation6], %s1896_s8 }
  0x17   : > { %205 = vst [vmem:[#allocation2 + $0x68] sm:$0xff] %v2262_v0  ;;  %206 = vst [vmem:[#allocation2 + $0x70] sm:$0xff] %v2262_v0  ;;  %s185_s25 = scalar_select %p184_p10, %s2338_s24, 511 }
  0x18   : > { %207 = vst [vmem:[#allocation2 + $0x78] sm:$0xff] %v2262_v0  ;;  %209 = vst [vmem:[#allocation2 + $0x88] sm:$0xff] %v2262_v0  ;;  %s2138_s19 = scalar_lea.vmem %s3157_s9, 256 }
  0x19   : > { %210 = vst [vmem:[#allocation2 + $0x90] sm:$0xff] %v2262_v0  ;;  %211 = vst [vmem:[#allocation2 + $0x98] sm:$0xff] %v2262_v0  ;;  %s2072_s26 = sshll.u32 %s185_s25, 3  ;;  %p2139_p11 = scmp.ne.s32.totalorder %s3157_s9, %s2138_s19 }
  0x1a   : > { %212 = vst [vmem:[#allocation2 + $0xa0] sm:$0xff] %v2262_v0  ;;  %213 = vst [vmem:[#allocation2 + $0xa8] sm:$0xff] %v2262_v0  ;;  %s2603_s29 = scalar_lea.vmem %s3266_s0, %s2072_s26  ;;  %s2264_s25 = smov [#allocation5]  }
  0x1b   : > { %214 = vst [vmem:[#allocation2 + $0xb0] sm:$0xff] %v2262_v0  ;;  %215 = vst [vmem:[#allocation2 + $0xb8] sm:$0xff] %v2262_v0  ;;  %v464_v1 = vld [vmem:[%s2603_s29 + $0x80] sm:$0xff]  ;;  %v465_v3 = vld [vmem:[%s2603_s29 + $0x88] sm:$0xff]  ;;  %p2140_p12 = pnand %p2139_p11, %p2327_p5  ;;  %s2142_s26 = sshll.u32 %s2264_s25, 4  ;;  %s2143_s26 = int_to_ptr.vmem [resolvable:$false] %s2142_s26 }
  0x1c   : > { %216 = vst [vmem:[#allocation2 + $0xc0] sm:$0xff] %v2262_v0  ;;  %217 = vst [vmem:[#allocation2 + $0xc8] sm:$0xff] %v2262_v0  ;;  %v448_v2 = vld [vmem:[%s2603_s29] sm:$0xff]  ;;  %v449_v4 = vld [vmem:[%s2603_s29 + $0x8] sm:$0xff]  ;;  %p2145_p0 = scmp.lt.s32.totalorder %s3157_s9, %s2143_s26 }
  0x1d   : > { %218 = vst [vmem:[#allocation2 + $0xd0] sm:$0xff] %v2262_v0  ;;  %219 = vst [vmem:[#allocation2 + $0xd8] sm:$0xff] %v2262_v0  ;;  %v466_v5 = vld [vmem:[%s2603_s29 + $0x90] sm:$0xff]  ;;  %v467_v7 = vld [vmem:[%s2603_s29 + $0x98] sm:$0xff]  ;;  %p2141_p13 = pneg %p2140_p12 }
  0x1e   : > { %220 = vst [vmem:[#allocation2 + $0xe0] sm:$0xff] %v2262_v0  ;;  %221 = vst [vmem:[#allocation2 + $0xe8] sm:$0xff] %v2262_v0  ;;  %v450_v6 = vld [vmem:[%s2603_s29 + $0x10] sm:$0xff]  ;;  %v451_v8 = vld [vmem:[%s2603_s29 + $0x18] sm:$0xff] }
  0x1f   : > { %222 = vst [vmem:[#allocation2 + $0xf0] sm:$0xff] %v2262_v0  ;;  %223 = vst [vmem:[#allocation2 + $0xf8] sm:$0xff] %v2262_v0  ;;  %v468_v9 = vld [vmem:[%s2603_s29 + $0xa0] sm:$0xff]  ;;  %v469_v11 = vld [vmem:[%s2603_s29 + $0xa8] sm:$0xff] }
  0x20   : > { %224 = vst [vmem:[#allocation2 + $0x100] sm:$0xff] %v2262_v0  ;;  %225 = vst [vmem:[#allocation2 + $0x108] sm:$0xff] %v2262_v0  ;;  %v452_v10 = vld [vmem:[%s2603_s29 + $0x20] sm:$0xff]  ;;  %v453_v12 = vld [vmem:[%s2603_s29 + $0x28] sm:$0xff] }
  0x21   : > { %226 = vst [vmem:[#allocation2 + $0x110] sm:$0xff] %v2262_v0  ;;  %227 = vst [vmem:[#allocation2 + $0x118] sm:$0xff] %v2262_v0  ;;  %v470_v13 = vld [vmem:[%s2603_s29 + $0xb0] sm:$0xff]  ;;  %v471_v15 = vld [vmem:[%s2603_s29 + $0xb8] sm:$0xff] }
  0x22   : > { %228 = vst [vmem:[#allocation2 + $0x120] sm:$0xff] %v2262_v0  ;;  %229 = vst [vmem:[#allocation2 + $0x128] sm:$0xff] %v2262_v0  ;;  %v454_v14 = vld [vmem:[%s2603_s29 + $0x30] sm:$0xff]  ;;  %v455_v16 = vld [vmem:[%s2603_s29 + $0x38] sm:$0xff] }
  0x23   : > { %230 = vst [vmem:[#allocation2 + $0x130] sm:$0xff] %v2262_v0  ;;  %231 = vst [vmem:[#allocation2 + $0x138] sm:$0xff] %v2262_v0  ;;  %v472_v17 = vld [vmem:[%s2603_s29 + $0xc0] sm:$0xff]  ;;  %v473_v19 = vld [vmem:[%s2603_s29 + $0xc8] sm:$0xff] }
  0x24   : > { %232 = vst [vmem:[#allocation2 + $0x140] sm:$0xff] %v2262_v0  ;;  %233 = vst [vmem:[#allocation2 + $0x148] sm:$0xff] %v2262_v0  ;;  %v456_v18 = vld [vmem:[%s2603_s29 + $0x40] sm:$0xff]  ;;  %v457_v20 = vld [vmem:[%s2603_s29 + $0x48] sm:$0xff] }
  0x25   : > { %234 = vst [vmem:[#allocation2 + $0x150] sm:$0xff] %v2262_v0  ;;  %235 = vst [vmem:[#allocation2 + $0x158] sm:$0xff] %v2262_v0  ;;  %v474_v21 = vld [vmem:[%s2603_s29 + $0xd0] sm:$0xff]  ;;  %v475_v23 = vld [vmem:[%s2603_s29 + $0xd8] sm:$0xff] }
  0x26   : > { %236 = vst [vmem:[#allocation2 + $0x160] sm:$0xff] %v2262_v0  ;;  %237 = vst [vmem:[#allocation2 + $0x168] sm:$0xff] %v2262_v0  ;;  %v458_v22 = vld [vmem:[%s2603_s29 + $0x50] sm:$0xff]  ;;  %v459_v24 = vld [vmem:[%s2603_s29 + $0x58] sm:$0xff] }
  0x27   : > { %238 = vst [vmem:[#allocation2 + $0x170] sm:$0xff] %v2262_v0  ;;  %239 = vst [vmem:[#allocation2 + $0x178] sm:$0xff] %v2262_v0  ;;  %v476_v33 = vld [vmem:[%s2603_s29 + $0xe0] sm:$0xff]  ;;  %v477_v35 = vld [vmem:[%s2603_s29 + $0xe8] sm:$0xff] }
  0x28   : > { %240 = vst [vmem:[#allocation2 + $0x180] sm:$0xff] %v2262_v0  ;;  %241 = vst [vmem:[#allocation2 + $0x188] sm:$0xff] %v2262_v0  ;;  %v460_v34 = vld [vmem:[%s2603_s29 + $0x60] sm:$0xff]  ;;  %v461_v36 = vld [vmem:[%s2603_s29 + $0x68] sm:$0xff] }
  0x29   : > { %242 = vst [vmem:[#allocation2 + $0x190] sm:$0xff] %v2262_v0  ;;  %243 = vst [vmem:[#allocation2 + $0x198] sm:$0xff] %v2262_v0  ;;  %v478_v37 = vld [vmem:[%s2603_s29 + $0xf0] sm:$0xff]  ;;  %v479_v39 = vld [vmem:[%s2603_s29 + $0xf8] sm:$0xff] }
  0x2a   : > { %244 = vst [vmem:[#allocation2 + $0x1a0] sm:$0xff] %v2262_v0  ;;  %245 = vst [vmem:[#allocation2 + $0x1a8] sm:$0xff] %v2262_v0  ;;  %v462_v38 = vld [vmem:[%s2603_s29 + $0x70] sm:$0xff]  ;;  %v463_v40 = vld [vmem:[%s2603_s29 + $0x78] sm:$0xff] }
  0x2b   : > { %246 = vst [vmem:[#allocation2 + $0x1b0] sm:$0xff] %v2262_v0  ;;  %247 = vst [vmem:[#allocation2 + $0x1b8] sm:$0xff] %v2262_v0  ;;  %v496_v41 = vld [vmem:[%s2603_s29 + $0x180] sm:$0xff]  ;;  %v497_v43 = vld [vmem:[%s2603_s29 + $0x188] sm:$0xff] }
  0x2c   : > { %248 = vst [vmem:[#allocation2 + $0x1c0] sm:$0xff] %v2262_v0  ;;  %249 = vst [vmem:[#allocation2 + $0x1c8] sm:$0xff] %v2262_v0  ;;  %v480_v42 = vld [vmem:[%s2603_s29 + $0x100] sm:$0xff]  ;;  %v481_v44 = vld [vmem:[%s2603_s29 + $0x108] sm:$0xff] }
  0x2d   : > { %250 = vst [vmem:[#allocation2 + $0x1d0] sm:$0xff] %v2262_v0  ;;  %251 = vst [vmem:[#allocation2 + $0x1d8] sm:$0xff] %v2262_v0  ;;  %v498_v47 = vld [vmem:[%s2603_s29 + $0x190] sm:$0xff]  ;;  %v499_v49 = vld [vmem:[%s2603_s29 + $0x198] sm:$0xff] }
  0x2e   : > { %252 = vst [vmem:[#allocation2 + $0x1e0] sm:$0xff] %v2262_v0  ;;  %253 = vst [vmem:[#allocation2 + $0x1e8] sm:$0xff] %v2262_v0  ;;  %v482_v48 = vld [vmem:[%s2603_s29 + $0x110] sm:$0xff]  ;;  %v483_v50 = vld [vmem:[%s2603_s29 + $0x118] sm:$0xff] }
  0x2f   : > { %254 = vst [vmem:[#allocation2 + $0x1f0] sm:$0xff] %v2262_v0  ;;  %255 = vst [vmem:[#allocation2 + $0x1f8] sm:$0xff] %v2262_v0  ;;  %v500_v51 = vld [vmem:[%s2603_s29 + $0x1a0] sm:$0xff]  ;;  %v501_v53 = vld [vmem:[%s2603_s29 + $0x1a8] sm:$0xff] }
  0x30   : > { %256 = vst [vmem:[#allocation2 + $0x200] sm:$0xff] %v2262_v0  ;;  %257 = vst [vmem:[#allocation2 + $0x208] sm:$0xff] %v2262_v0  ;;  %v484_v52 = vld [vmem:[%s2603_s29 + $0x120] sm:$0xff]  ;;  %v485_v54 = vld [vmem:[%s2603_s29 + $0x128] sm:$0xff] }
  0x31   : > { %258 = vst [vmem:[#allocation2 + $0x210] sm:$0xff] %v2262_v0  ;;  %259 = vst [vmem:[#allocation2 + $0x218] sm:$0xff] %v2262_v0  ;;  %v502_v55 = vld [vmem:[%s2603_s29 + $0x1b0] sm:$0xff]  ;;  %v503_v57 = vld [vmem:[%s2603_s29 + $0x1b8] sm:$0xff] }
  0x32   : > { %260 = vst [vmem:[#allocation2 + $0x220] sm:$0xff] %v2262_v0  ;;  %261 = vst [vmem:[#allocation2 + $0x228] sm:$0xff] %v2262_v0  ;;  %v486_v56 = vld [vmem:[%s2603_s29 + $0x130] sm:$0xff]  ;;  %v487_v58 = vld [vmem:[%s2603_s29 + $0x138] sm:$0xff] }
  0x33   : > { %262 = vst [vmem:[#allocation2 + $0x230] sm:$0xff] %v2262_v0  ;;  %263 = vst [vmem:[#allocation2 + $0x238] sm:$0xff] %v2262_v0 }
  0x34   : > { %264 = vst [vmem:[#allocation2 + $0x240] sm:$0xff] %v2262_v0  ;;  %265 = vst [vmem:[#allocation2 + $0x248] sm:$0xff] %v2262_v0 }
  0x35   : > { %266 = vst [vmem:[#allocation2 + $0x250] sm:$0xff] %v2262_v0  ;;  %267 = vst [vmem:[#allocation2 + $0x258] sm:$0xff] %v2262_v0 }
  0x36   : > { %268 = vst [vmem:[#allocation2 + $0x260] sm:$0xff] %v2262_v0  ;;  %269 = vst [vmem:[#allocation2 + $0x268] sm:$0xff] %v2262_v0 }
  0x37   : > { %270 = vst [vmem:[#allocation2 + $0x270] sm:$0xff] %v2262_v0  ;;  %271 = vst [vmem:[#allocation2 + $0x278] sm:$0xff] %v2262_v0 }
  0x38   : > { %272 = vst [vmem:[#allocation2 + $0x280] sm:$0xff] %v2262_v0  ;;  %273 = vst [vmem:[#allocation2 + $0x288] sm:$0xff] %v2262_v0 }
  0x39   : > { %274 = vst [vmem:[#allocation2 + $0x290] sm:$0xff] %v2262_v0  ;;  %275 = vst [vmem:[#allocation2 + $0x298] sm:$0xff] %v2262_v0 }
  0x3a   : > { %276 = vst [vmem:[#allocation2 + $0x2a0] sm:$0xff] %v2262_v0  ;;  %277 = vst [vmem:[#allocation2 + $0x2a8] sm:$0xff] %v2262_v0 }
  0x3b   : > { %278 = vst [vmem:[#allocation2 + $0x2b0] sm:$0xff] %v2262_v0  ;;  %279 = vst [vmem:[#allocation2 + $0x2b8] sm:$0xff] %v2262_v0 }
  0x3c   : > { %280 = vst [vmem:[#allocation2 + $0x2c0] sm:$0xff] %v2262_v0  ;;  %281 = vst [vmem:[#allocation2 + $0x2c8] sm:$0xff] %v2262_v0 }
  0x3d   : > { %282 = vst [vmem:[#allocation2 + $0x2d0] sm:$0xff] %v2262_v0  ;;  %283 = vst [vmem:[#allocation2 + $0x2d8] sm:$0xff] %v2262_v0 }
  0x3e   : > { %284 = vst [vmem:[#allocation2 + $0x2e0] sm:$0xff] %v2262_v0  ;;  %285 = vst [vmem:[#allocation2 + $0x2e8] sm:$0xff] %v2262_v0 }
  0x3f   : > { %286 = vst [vmem:[#allocation2 + $0x2f0] sm:$0xff] %v2262_v0  ;;  %287 = vst [vmem:[#allocation2 + $0x2f8] sm:$0xff] %v2262_v0 }
  0x40   : > { %288 = vst [vmem:[#allocation2 + $0x300] sm:$0xff] %v2262_v0  ;;  %289 = vst [vmem:[#allocation2 + $0x308] sm:$0xff] %v2262_v0 }
  0x41   : > { %290 = vst [vmem:[#allocation2 + $0x310] sm:$0xff] %v2262_v0  ;;  %291 = vst [vmem:[#allocation2 + $0x318] sm:$0xff] %v2262_v0 }
  0x42   : > { %292 = vst [vmem:[#allocation2 + $0x320] sm:$0xff] %v2262_v0  ;;  %293 = vst [vmem:[#allocation2 + $0x328] sm:$0xff] %v2262_v0 }
  0x43   : > { %294 = vst [vmem:[#allocation2 + $0x330] sm:$0xff] %v2262_v0  ;;  %295 = vst [vmem:[#allocation2 + $0x338] sm:$0xff] %v2262_v0 }
  0x44   : > { %296 = vst [vmem:[#allocation2 + $0x340] sm:$0xff] %v2262_v0  ;;  %297 = vst [vmem:[#allocation2 + $0x348] sm:$0xff] %v2262_v0 }
  0x45   : > { %298 = vst [vmem:[#allocation2 + $0x350] sm:$0xff] %v2262_v0  ;;  %299 = vst [vmem:[#allocation2 + $0x358] sm:$0xff] %v2262_v0 }
  0x46   : > { %300 = vst [vmem:[#allocation2 + $0x360] sm:$0xff] %v2262_v0  ;;  %301 = vst [vmem:[#allocation2 + $0x368] sm:$0xff] %v2262_v0 }
  0x47   : > { %302 = vst [vmem:[#allocation2 + $0x370] sm:$0xff] %v2262_v0  ;;  %303 = vst [vmem:[#allocation2 + $0x378] sm:$0xff] %v2262_v0 }
  0x48   : > { %304 = vst [vmem:[#allocation2 + $0x380] sm:$0xff] %v2262_v0  ;;  %305 = vst [vmem:[#allocation2 + $0x388] sm:$0xff] %v2262_v0 }
  0x49   : > { %306 = vst [vmem:[#allocation2 + $0x390] sm:$0xff] %v2262_v0  ;;  %307 = vst [vmem:[#allocation2 + $0x398] sm:$0xff] %v2262_v0 }
  0x4a   : > { %308 = vst [vmem:[#allocation2 + $0x3a0] sm:$0xff] %v2262_v0  ;;  %309 = vst [vmem:[#allocation2 + $0x3a8] sm:$0xff] %v2262_v0 }
  0x4b   : > { %310 = vst [vmem:[#allocation2 + $0x3b0] sm:$0xff] %v2262_v0  ;;  %311 = vst [vmem:[#allocation2 + $0x3b8] sm:$0xff] %v2262_v0 }
  0x4c   : > { %312 = vst [vmem:[#allocation2 + $0x3c0] sm:$0xff] %v2262_v0  ;;  %313 = vst [vmem:[#allocation2 + $0x3c8] sm:$0xff] %v2262_v0 }
  0x4d   : > { %314 = vst [vmem:[#allocation2 + $0x3d0] sm:$0xff] %v2262_v0  ;;  %315 = vst [vmem:[#allocation2 + $0x3d8] sm:$0xff] %v2262_v0 }
  0x4e   : > { %316 = vst [vmem:[#allocation2 + $0x3e0] sm:$0xff] %v2262_v0  ;;  %317 = vst [vmem:[#allocation2 + $0x3e8] sm:$0xff] %v2262_v0 }
  0x4f   : > { %318 = vst [vmem:[#allocation2 + $0x3f0] sm:$0xff] %v2262_v0  ;;  %319 = vst [vmem:[#allocation2 + $0x3f8] sm:$0xff] %v2262_v0 }
  0x50   : > { %320 = vst [vmem:[#allocation2 + $0x400] sm:$0xff] %v2262_v0  ;;  %321 = vst [vmem:[#allocation2 + $0x408] sm:$0xff] %v2262_v0 }
  0x51   : > { %322 = vst [vmem:[#allocation2 + $0x410] sm:$0xff] %v2262_v0  ;;  %323 = vst [vmem:[#allocation2 + $0x418] sm:$0xff] %v2262_v0 }
  0x52   : > { %324 = vst [vmem:[#allocation2 + $0x420] sm:$0xff] %v2262_v0  ;;  %325 = vst [vmem:[#allocation2 + $0x428] sm:$0xff] %v2262_v0 }
  0x53   : > { %326 = vst [vmem:[#allocation2 + $0x430] sm:$0xff] %v2262_v0  ;;  %327 = vst [vmem:[#allocation2 + $0x438] sm:$0xff] %v2262_v0 }
  0x54   : > { %328 = vst [vmem:[#allocation2 + $0x440] sm:$0xff] %v2262_v0  ;;  %329 = vst [vmem:[#allocation2 + $0x448] sm:$0xff] %v2262_v0 }
  0x55   : > { %330 = vst [vmem:[#allocation2 + $0x450] sm:$0xff] %v2262_v0  ;;  %331 = vst [vmem:[#allocation2 + $0x458] sm:$0xff] %v2262_v0 }
  0x56   : > { %332 = vst [vmem:[#allocation2 + $0x460] sm:$0xff] %v2262_v0  ;;  %333 = vst [vmem:[#allocation2 + $0x468] sm:$0xff] %v2262_v0 }
  0x57   : > { %334 = vst [vmem:[#allocation2 + $0x470] sm:$0xff] %v2262_v0  ;;  %335 = vst [vmem:[#allocation2 + $0x478] sm:$0xff] %v2262_v0 }
  0x58   : > { %336 = vst [vmem:[#allocation2 + $0x480] sm:$0xff] %v2262_v0  ;;  %337 = vst [vmem:[#allocation2 + $0x488] sm:$0xff] %v2262_v0 }
  0x59   : > { %338 = vst [vmem:[#allocation2 + $0x490] sm:$0xff] %v2262_v0  ;;  %339 = vst [vmem:[#allocation2 + $0x498] sm:$0xff] %v2262_v0 }
  0x5a   : > { %340 = vst [vmem:[#allocation2 + $0x4a0] sm:$0xff] %v2262_v0  ;;  %341 = vst [vmem:[#allocation2 + $0x4a8] sm:$0xff] %v2262_v0 }
  0x5b   : > { %342 = vst [vmem:[#allocation2 + $0x4b0] sm:$0xff] %v2262_v0  ;;  %343 = vst [vmem:[#allocation2 + $0x4b8] sm:$0xff] %v2262_v0 }
  0x5c   : > { %344 = vst [vmem:[#allocation2 + $0x4c0] sm:$0xff] %v2262_v0  ;;  %345 = vst [vmem:[#allocation2 + $0x4c8] sm:$0xff] %v2262_v0 }
  0x5d   : > { %346 = vst [vmem:[#allocation2 + $0x4d0] sm:$0xff] %v2262_v0  ;;  %347 = vst [vmem:[#allocation2 + $0x4d8] sm:$0xff] %v2262_v0 }
  0x5e   : > { %348 = vst [vmem:[#allocation2 + $0x4e0] sm:$0xff] %v2262_v0  ;;  %349 = vst [vmem:[#allocation2 + $0x4e8] sm:$0xff] %v2262_v0 }
  0x5f   : > { %350 = vst [vmem:[#allocation2 + $0x4f0] sm:$0xff] %v2262_v0  ;;  %351 = vst [vmem:[#allocation2 + $0x4f8] sm:$0xff] %v2262_v0 }
  0x60   : > { %352 = vst [vmem:[#allocation2 + $0x500] sm:$0xff] %v2262_v0  ;;  %353 = vst [vmem:[#allocation2 + $0x508] sm:$0xff] %v2262_v0 }
  0x61   : > { %354 = vst [vmem:[#allocation2 + $0x510] sm:$0xff] %v2262_v0  ;;  %355 = vst [vmem:[#allocation2 + $0x518] sm:$0xff] %v2262_v0 }
  0x62   : > { %356 = vst [vmem:[#allocation2 + $0x520] sm:$0xff] %v2262_v0  ;;  %357 = vst [vmem:[#allocation2 + $0x528] sm:$0xff] %v2262_v0 }
  0x63   : > { %358 = vst [vmem:[#allocation2 + $0x530] sm:$0xff] %v2262_v0  ;;  %359 = vst [vmem:[#allocation2 + $0x538] sm:$0xff] %v2262_v0 }
  0x64   : > { %360 = vst [vmem:[#allocation2 + $0x540] sm:$0xff] %v2262_v0  ;;  %361 = vst [vmem:[#allocation2 + $0x548] sm:$0xff] %v2262_v0 }
  0x65   : > { %362 = vst [vmem:[#allocation2 + $0x550] sm:$0xff] %v2262_v0  ;;  %363 = vst [vmem:[#allocation2 + $0x558] sm:$0xff] %v2262_v0 }
  0x66   : > { %364 = vst [vmem:[#allocation2 + $0x560] sm:$0xff] %v2262_v0  ;;  %365 = vst [vmem:[#allocation2 + $0x568] sm:$0xff] %v2262_v0 }
  0x67   : > { %366 = vst [vmem:[#allocation2 + $0x570] sm:$0xff] %v2262_v0  ;;  %367 = vst [vmem:[#allocation2 + $0x578] sm:$0xff] %v2262_v0 }
  0x68   : > { %368 = vst [vmem:[#allocation2 + $0x580] sm:$0xff] %v2262_v0  ;;  %369 = vst [vmem:[#allocation2 + $0x588] sm:$0xff] %v2262_v0 }
  0x69   : > { %370 = vst [vmem:[#allocation2 + $0x590] sm:$0xff] %v2262_v0  ;;  %371 = vst [vmem:[#allocation2 + $0x598] sm:$0xff] %v2262_v0 }
  0x6a   : > { %372 = vst [vmem:[#allocation2 + $0x5a0] sm:$0xff] %v2262_v0  ;;  %373 = vst [vmem:[#allocation2 + $0x5a8] sm:$0xff] %v2262_v0 }
  0x6b   : > { %374 = vst [vmem:[#allocation2 + $0x5b0] sm:$0xff] %v2262_v0  ;;  %375 = vst [vmem:[#allocation2 + $0x5b8] sm:$0xff] %v2262_v0 }
  0x6c   : > { %376 = vst [vmem:[#allocation2 + $0x5c0] sm:$0xff] %v2262_v0  ;;  %377 = vst [vmem:[#allocation2 + $0x5c8] sm:$0xff] %v2262_v0 }
  0x6d   : > { %378 = vst [vmem:[#allocation2 + $0x5d0] sm:$0xff] %v2262_v0  ;;  %379 = vst [vmem:[#allocation2 + $0x5d8] sm:$0xff] %v2262_v0 }
  0x6e   : > { %380 = vst [vmem:[#allocation2 + $0x5e0] sm:$0xff] %v2262_v0  ;;  %381 = vst [vmem:[#allocation2 + $0x5e8] sm:$0xff] %v2262_v0 }
  0x6f   : > { %382 = vst [vmem:[#allocation2 + $0x5f0] sm:$0xff] %v2262_v0  ;;  %383 = vst [vmem:[#allocation2 + $0x5f8] sm:$0xff] %v2262_v0 }
  0x70   : > { %384 = vst [vmem:[#allocation2 + $0x600] sm:$0xff] %v2262_v0  ;;  %385 = vst [vmem:[#allocation2 + $0x608] sm:$0xff] %v2262_v0 }
  0x71   : > { %386 = vst [vmem:[#allocation2 + $0x610] sm:$0xff] %v2262_v0  ;;  %387 = vst [vmem:[#allocation2 + $0x618] sm:$0xff] %v2262_v0 }
  0x72   : > { %388 = vst [vmem:[#allocation2 + $0x620] sm:$0xff] %v2262_v0  ;;  %389 = vst [vmem:[#allocation2 + $0x628] sm:$0xff] %v2262_v0 }
  0x73   : > { %390 = vst [vmem:[#allocation2 + $0x630] sm:$0xff] %v2262_v0  ;;  %391 = vst [vmem:[#allocation2 + $0x638] sm:$0xff] %v2262_v0 }
  0x74   : > { %392 = vst [vmem:[#allocation2 + $0x640] sm:$0xff] %v2262_v0  ;;  %393 = vst [vmem:[#allocation2 + $0x648] sm:$0xff] %v2262_v0 }
  0x75   : > { %394 = vst [vmem:[#allocation2 + $0x650] sm:$0xff] %v2262_v0  ;;  %395 = vst [vmem:[#allocation2 + $0x658] sm:$0xff] %v2262_v0 }
  0x76   : > { %396 = vst [vmem:[#allocation2 + $0x660] sm:$0xff] %v2262_v0  ;;  %397 = vst [vmem:[#allocation2 + $0x668] sm:$0xff] %v2262_v0 }
  0x77   : > { %398 = vst [vmem:[#allocation2 + $0x670] sm:$0xff] %v2262_v0  ;;  %399 = vst [vmem:[#allocation2 + $0x678] sm:$0xff] %v2262_v0 }
  0x78   : > { %400 = vst [vmem:[#allocation2 + $0x680] sm:$0xff] %v2262_v0  ;;  %401 = vst [vmem:[#allocation2 + $0x688] sm:$0xff] %v2262_v0 }
  0x79   : > { %402 = vst [vmem:[#allocation2 + $0x690] sm:$0xff] %v2262_v0  ;;  %403 = vst [vmem:[#allocation2 + $0x698] sm:$0xff] %v2262_v0 }
  0x7a   : > { %404 = vst [vmem:[#allocation2 + $0x6a0] sm:$0xff] %v2262_v0  ;;  %405 = vst [vmem:[#allocation2 + $0x6a8] sm:$0xff] %v2262_v0 }
  0x7b   : > { %406 = vst [vmem:[#allocation2 + $0x6b0] sm:$0xff] %v2262_v0  ;;  %407 = vst [vmem:[#allocation2 + $0x6b8] sm:$0xff] %v2262_v0 }
  0x7c   : > { %408 = vst [vmem:[#allocation2 + $0x6c0] sm:$0xff] %v2262_v0  ;;  %409 = vst [vmem:[#allocation2 + $0x6c8] sm:$0xff] %v2262_v0 }
  0x7d   : > { %410 = vst [vmem:[#allocation2 + $0x6d0] sm:$0xff] %v2262_v0  ;;  %411 = vst [vmem:[#allocation2 + $0x6d8] sm:$0xff] %v2262_v0 }
  0x7e   : > { %412 = vst [vmem:[#allocation2 + $0x6e0] sm:$0xff] %v2262_v0  ;;  %413 = vst [vmem:[#allocation2 + $0x6e8] sm:$0xff] %v2262_v0 }
  0x7f   : > { %414 = vst [vmem:[#allocation2 + $0x6f0] sm:$0xff] %v2262_v0  ;;  %415 = vst [vmem:[#allocation2 + $0x6f8] sm:$0xff] %v2262_v0 }
  0x80   : > { %416 = vst [vmem:[#allocation2 + $0x700] sm:$0xff] %v2262_v0  ;;  %417 = vst [vmem:[#allocation2 + $0x708] sm:$0xff] %v2262_v0 }
  0x81   : > { %418 = vst [vmem:[#allocation2 + $0x710] sm:$0xff] %v2262_v0  ;;  %419 = vst [vmem:[#allocation2 + $0x718] sm:$0xff] %v2262_v0 }
  0x82   : > { %420 = vst [vmem:[#allocation2 + $0x720] sm:$0xff] %v2262_v0  ;;  %421 = vst [vmem:[#allocation2 + $0x728] sm:$0xff] %v2262_v0 }
  0x83   : > { %422 = vst [vmem:[#allocation2 + $0x730] sm:$0xff] %v2262_v0  ;;  %423 = vst [vmem:[#allocation2 + $0x738] sm:$0xff] %v2262_v0 }
  0x84   : > { %424 = vst [vmem:[#allocation2 + $0x740] sm:$0xff] %v2262_v0  ;;  %425 = vst [vmem:[#allocation2 + $0x748] sm:$0xff] %v2262_v0 }
  0x85   : > { %426 = vst [vmem:[#allocation2 + $0x750] sm:$0xff] %v2262_v0  ;;  %427 = vst [vmem:[#allocation2 + $0x758] sm:$0xff] %v2262_v0 }
  0x86   : > { %428 = vst [vmem:[#allocation2 + $0x760] sm:$0xff] %v2262_v0  ;;  %429 = vst [vmem:[#allocation2 + $0x768] sm:$0xff] %v2262_v0 }
  0x87   : > { %430 = vst [vmem:[#allocation2 + $0x770] sm:$0xff] %v2262_v0  ;;  %431 = vst [vmem:[#allocation2 + $0x778] sm:$0xff] %v2262_v0 }
  0x88   : > { %432 = vst [vmem:[#allocation2 + $0x780] sm:$0xff] %v2262_v0  ;;  %433 = vst [vmem:[#allocation2 + $0x788] sm:$0xff] %v2262_v0 }
  0x89   : > { %434 = vst [vmem:[#allocation2 + $0x790] sm:$0xff] %v2262_v0  ;;  %435 = vst [vmem:[#allocation2 + $0x798] sm:$0xff] %v2262_v0 }
  0x8a   : > { %436 = vst [vmem:[#allocation2 + $0x7a0] sm:$0xff] %v2262_v0  ;;  %437 = vst [vmem:[#allocation2 + $0x7a8] sm:$0xff] %v2262_v0 }
  0x8b   : > { %438 = vst [vmem:[#allocation2 + $0x7b0] sm:$0xff] %v2262_v0  ;;  %439 = vst [vmem:[#allocation2 + $0x7b8] sm:$0xff] %v2262_v0 }
  0x8c   : > { %440 = vst [vmem:[#allocation2 + $0x7c0] sm:$0xff] %v2262_v0  ;;  %441 = vst [vmem:[#allocation2 + $0x7c8] sm:$0xff] %v2262_v0 }
  0x8d   : > { %442 = vst [vmem:[#allocation2 + $0x7d0] sm:$0xff] %v2262_v0  ;;  %443 = vst [vmem:[#allocation2 + $0x7d8] sm:$0xff] %v2262_v0 }
  0x8e   : > { %444 = vst [vmem:[#allocation2 + $0x7e0] sm:$0xff] %v2262_v0  ;;  %445 = vst [vmem:[#allocation2 + $0x7e8] sm:$0xff] %v2262_v0 }
  0x8f   : > { %446 = vst [vmem:[#allocation2 + $0x7f0] sm:$0xff] %v2262_v0  ;;  %447 = vst [vmem:[#allocation2 + $0x7f8] sm:$0xff] %v2262_v0 }
  0x90   : > { %721 = vst.msk [vmem:[#allocation2 + $0x80] sm:$0xff] %vm704_vm0, %v464_v1  ;;  %705 = vst.msk [vmem:[#allocation2] sm:$0xff] %vm704_vm0, %v448_v2  ;;  %v504_v1 = vld [vmem:[%s2603_s29 + $0x1c0] sm:$0xff] }
  0x91   : > { %722 = vst.msk [vmem:[#allocation2 + $0x88] sm:$0xff] %vm704_vm0, %v465_v3  ;;  %706 = vst.msk [vmem:[#allocation2 + $0x8] sm:$0xff] %vm704_vm0, %v449_v4  ;;  %v488_v2 = vld [vmem:[%s2603_s29 + $0x140] sm:$0xff]  ;;  %v505_v3 = vld [vmem:[%s2603_s29 + $0x1c8] sm:$0xff] }
  0x92   : > { %723 = vst.msk [vmem:[#allocation2 + $0x90] sm:$0xff] %vm704_vm0, %v466_v5  ;;  %707 = vst.msk [vmem:[#allocation2 + $0x10] sm:$0xff] %vm704_vm0, %v450_v6  ;;  %v489_v4 = vld [vmem:[%s2603_s29 + $0x148] sm:$0xff]  ;;  %v506_v5 = vld [vmem:[%s2603_s29 + $0x1d0] sm:$0xff] }
  0x93   : > { %724 = vst.msk [vmem:[#allocation2 + $0x98] sm:$0xff] %vm704_vm0, %v467_v7  ;;  %708 = vst.msk [vmem:[#allocation2 + $0x18] sm:$0xff] %vm704_vm0, %v451_v8  ;;  %v490_v6 = vld [vmem:[%s2603_s29 + $0x150] sm:$0xff]  ;;  %v507_v7 = vld [vmem:[%s2603_s29 + $0x1d8] sm:$0xff] }
  0x94   : > { %725 = vst.msk [vmem:[#allocation2 + $0xa0] sm:$0xff] %vm704_vm0, %v468_v9  ;;  %709 = vst.msk [vmem:[#allocation2 + $0x20] sm:$0xff] %vm704_vm0, %v452_v10  ;;  %v491_v8 = vld [vmem:[%s2603_s29 + $0x158] sm:$0xff]  ;;  %v508_v9 = vld [vmem:[%s2603_s29 + $0x1e0] sm:$0xff] }
  0x95   : > { %726 = vst.msk [vmem:[#allocation2 + $0xa8] sm:$0xff] %vm704_vm0, %v469_v11  ;;  %710 = vst.msk [vmem:[#allocation2 + $0x28] sm:$0xff] %vm704_vm0, %v453_v12  ;;  %v492_v10 = vld [vmem:[%s2603_s29 + $0x160] sm:$0xff]  ;;  %v509_v11 = vld [vmem:[%s2603_s29 + $0x1e8] sm:$0xff] }
  0x96   : > { %727 = vst.msk [vmem:[#allocation2 + $0xb0] sm:$0xff] %vm704_vm0, %v470_v13  ;;  %711 = vst.msk [vmem:[#allocation2 + $0x30] sm:$0xff] %vm704_vm0, %v454_v14  ;;  %v493_v12 = vld [vmem:[%s2603_s29 + $0x168] sm:$0xff] }
  0x97   : > { %728 = vst.msk [vmem:[#allocation2 + $0xb8] sm:$0xff] %vm704_vm0, %v471_v15  ;;  %712 = vst.msk [vmem:[#allocation2 + $0x38] sm:$0xff] %vm704_vm0, %v455_v16  ;;  %v977_v25 = vld [vmem:[#allocation2 + $0x80] sm:$0xff]  ;;  %v510_v15 = vld [vmem:[%s2603_s29 + $0x1f0] sm:$0xff] }
  0x98   : > { %729 = vst.msk [vmem:[#allocation2 + $0xc0] sm:$0xff] %vm704_vm0, %v472_v17  ;;  %713 = vst.msk [vmem:[#allocation2 + $0x40] sm:$0xff] %vm704_vm0, %v456_v18  ;;  %v961_v26 = vld [vmem:[#allocation2] sm:$0xff]  ;;  %1249 = vxpose.xlu1.b32.start [1/16] (narrow) %v977_v25, 8  ;;  %v978_v27 = vld [vmem:[#allocation2 + $0x88] sm:$0xff] }
  0x99   : > { %730 = vst.msk [vmem:[#allocation2 + $0xc8] sm:$0xff] %vm704_vm0, %v473_v19  ;;  %714 = vst.msk [vmem:[#allocation2 + $0x48] sm:$0xff] %vm704_vm0, %v457_v20  ;;  %1217 = vxpose.xlu0.b32.start [1/16] (narrow) %v961_v26, 8  ;;  %v962_v28 = vld [vmem:[#allocation2 + $0x8] sm:$0xff]  ;;  %v979_v29 = vld [vmem:[#allocation2 + $0x90] sm:$0xff] }
  0x9a   : > { %731 = vst.msk [vmem:[#allocation2 + $0xd0] sm:$0xff] %vm704_vm0, %v474_v21  ;;  %715 = vst.msk [vmem:[#allocation2 + $0x50] sm:$0xff] %vm704_vm0, %v458_v22  ;;  %v963_v30 = vld [vmem:[#allocation2 + $0x10] sm:$0xff]  ;;  %v980_v31 = vld [vmem:[#allocation2 + $0x98] sm:$0xff] }
  0x9b   : > { %732 = vst.msk [vmem:[#allocation2 + $0xd8] sm:$0xff] %vm704_vm0, %v475_v23  ;;  %716 = vst.msk [vmem:[#allocation2 + $0x58] sm:$0xff] %vm704_vm0, %v459_v24  ;;  %v964_v32 = vld [vmem:[#allocation2 + $0x18] sm:$0xff]  ;;  %v981_v45 = vld [vmem:[#allocation2 + $0xa0] sm:$0xff] }
  0x9c   : > { %1250 = vxpose.xlu1.b32.cont [2/16] (narrow) %v978_v27, 8  ;;  %733 = vst.msk [vmem:[#allocation2 + $0xe0] sm:$0xff] %vm704_vm0, %v476_v33  ;;  %717 = vst.msk [vmem:[#allocation2 + $0x60] sm:$0xff] %vm704_vm0, %v460_v34  ;;  %v965_v46 = vld [vmem:[#allocation2 + $0x20] sm:$0xff]  ;;  %v982_v59 = vld [vmem:[#allocation2 + $0xa8] sm:$0xff] }
  0x9d   : > { %1218 = vxpose.xlu0.b32.cont [2/16] (narrow) %v962_v28, 8  ;;  %734 = vst.msk [vmem:[#allocation2 + $0xe8] sm:$0xff] %vm704_vm0, %v477_v35  ;;  %718 = vst.msk [vmem:[#allocation2 + $0x68] sm:$0xff] %vm704_vm0, %v461_v36  ;;  %v966_v60 = vld [vmem:[#allocation2 + $0x28] sm:$0xff]  ;;  %v983_v61 = vld [vmem:[#allocation2 + $0xb0] sm:$0xff] }
  0x9e   : > { %735 = vst.msk [vmem:[#allocation2 + $0xf0] sm:$0xff] %vm704_vm0, %v478_v37  ;;  %719 = vst.msk [vmem:[#allocation2 + $0x70] sm:$0xff] %vm704_vm0, %v462_v38  ;;  %v967_v62 = vld [vmem:[#allocation2 + $0x30] sm:$0xff]  ;;  %v984_v63 = vld [vmem:[#allocation2 + $0xb8] sm:$0xff] }
  0x9f   : > { %736 = vst.msk [vmem:[#allocation2 + $0xf8] sm:$0xff] %vm704_vm0, %v479_v39  ;;  %720 = vst.msk [vmem:[#allocation2 + $0x78] sm:$0xff] %vm704_vm0, %v463_v40  ;;  %v968_v0 = vld [vmem:[#allocation2 + $0x38] sm:$0xff]  ;;  %v985_v13 = vld [vmem:[#allocation2 + $0xc0] sm:$0xff] }
  0xa0   : > { %1251 = vxpose.xlu1.b32.cont [3/16] (narrow) %v979_v29, 8  ;;  %753 = vst.msk [vmem:[#allocation2 + $0x180] sm:$0xff] %vm704_vm0, %v496_v41  ;;  %737 = vst.msk [vmem:[#allocation2 + $0x100] sm:$0xff] %vm704_vm0, %v480_v42  ;;  %v969_v14 = vld [vmem:[#allocation2 + $0x40] sm:$0xff]  ;;  %v494_v16 = vld [vmem:[%s2603_s29 + $0x170] sm:$0xff] }
  0xa1   : > { %1219 = vxpose.xlu0.b32.cont [3/16] (narrow) %v963_v30, 8  ;;  %754 = vst.msk [vmem:[#allocation2 + $0x188] sm:$0xff] %vm704_vm0, %v497_v43  ;;  %738 = vst.msk [vmem:[#allocation2 + $0x108] sm:$0xff] %vm704_vm0, %v481_v44  ;;  %v511_v17 = vld [vmem:[%s2603_s29 + $0x1f8] sm:$0xff]  ;;  %v528_v19 = vld [vmem:[%s2603_s29 + $0x280] sm:$0xff] }
  0xa2   : > { %755 = vst.msk [vmem:[#allocation2 + $0x190] sm:$0xff] %vm704_vm0, %v498_v47  ;;  %739 = vst.msk [vmem:[#allocation2 + $0x110] sm:$0xff] %vm704_vm0, %v482_v48  ;;  %v495_v18 = vld [vmem:[%s2603_s29 + $0x178] sm:$0xff]  ;;  %v512_v20 = vld [vmem:[%s2603_s29 + $0x200] sm:$0xff] }
  0xa3   : > { %756 = vst.msk [vmem:[#allocation2 + $0x198] sm:$0xff] %vm704_vm0, %v499_v49  ;;  %740 = vst.msk [vmem:[#allocation2 + $0x118] sm:$0xff] %vm704_vm0, %v483_v50  ;;  %v529_v21 = vld [vmem:[%s2603_s29 + $0x288] sm:$0xff]  ;;  %v530_v23 = vld [vmem:[%s2603_s29 + $0x290] sm:$0xff] }
  0xa4   : > { %1252 = vxpose.xlu1.b32.cont [4/16] (narrow) %v980_v31, 8  ;;  %757 = vst.msk [vmem:[#allocation2 + $0x1a0] sm:$0xff] %vm704_vm0, %v500_v51  ;;  %741 = vst.msk [vmem:[#allocation2 + $0x120] sm:$0xff] %vm704_vm0, %v484_v52  ;;  %v513_v22 = vld [vmem:[%s2603_s29 + $0x208] sm:$0xff]  ;;  %v514_v24 = vld [vmem:[%s2603_s29 + $0x210] sm:$0xff] }
  0xa5   : > { %1220 = vxpose.xlu0.b32.cont [4/16] (narrow) %v964_v32, 8  ;;  %758 = vst.msk [vmem:[#allocation2 + $0x1a8] sm:$0xff] %vm704_vm0, %v501_v53  ;;  %742 = vst.msk [vmem:[#allocation2 + $0x128] sm:$0xff] %vm704_vm0, %v485_v54  ;;  %v531_v25 = vld [vmem:[%s2603_s29 + $0x298] sm:$0xff]  ;;  %v986_v27 = vld [vmem:[#allocation2 + $0xc8] sm:$0xff] }
  0xa6   : > { %759 = vst.msk [vmem:[#allocation2 + $0x1b0] sm:$0xff] %vm704_vm0, %v502_v55  ;;  %743 = vst.msk [vmem:[#allocation2 + $0x130] sm:$0xff] %vm704_vm0, %v486_v56  ;;  %v515_v26 = vld [vmem:[%s2603_s29 + $0x218] sm:$0xff]  ;;  %v970_v28 = vld [vmem:[#allocation2 + $0x48] sm:$0xff] }
  0xa7   : > { %760 = vst.msk [vmem:[#allocation2 + $0x1b8] sm:$0xff] %vm704_vm0, %v503_v57  ;;  %744 = vst.msk [vmem:[#allocation2 + $0x138] sm:$0xff] %vm704_vm0, %v487_v58  ;;  %v987_v29 = vld [vmem:[#allocation2 + $0xd0] sm:$0xff]  ;;  %v988_v31 = vld [vmem:[#allocation2 + $0xd8] sm:$0xff] }
  0xa8   : > { %1253 = vxpose.xlu1.b32.cont [5/16] (narrow) %v981_v45, 8  ;;  %761 = vst.msk [vmem:[#allocation2 + $0x1c0] sm:$0xff] %vm704_vm0, %v504_v1  ;;  %745 = vst.msk [vmem:[#allocation2 + $0x140] sm:$0xff] %vm704_vm0, %v488_v2  ;;  %v971_v30 = vld [vmem:[#allocation2 + $0x50] sm:$0xff]  ;;  %v972_v32 = vld [vmem:[#allocation2 + $0x58] sm:$0xff] }
  0xa9   : > { %1221 = vxpose.xlu0.b32.cont [5/16] (narrow) %v965_v46, 8  ;;  %762 = vst.msk [vmem:[#allocation2 + $0x1c8] sm:$0xff] %vm704_vm0, %v505_v3  ;;  %746 = vst.msk [vmem:[#allocation2 + $0x148] sm:$0xff] %vm704_vm0, %v489_v4  ;;  %v532_v33 = vld [vmem:[%s2603_s29 + $0x2a0] sm:$0xff]  ;;  %v533_v35 = vld [vmem:[%s2603_s29 + $0x2a8] sm:$0xff] }
  0xaa   : > { %763 = vst.msk [vmem:[#allocation2 + $0x1d0] sm:$0xff] %vm704_vm0, %v506_v5  ;;  %747 = vst.msk [vmem:[#allocation2 + $0x150] sm:$0xff] %vm704_vm0, %v490_v6  ;;  %v516_v34 = vld [vmem:[%s2603_s29 + $0x220] sm:$0xff]  ;;  %v517_v36 = vld [vmem:[%s2603_s29 + $0x228] sm:$0xff] }
  0xab   : > { %764 = vst.msk [vmem:[#allocation2 + $0x1d8] sm:$0xff] %vm704_vm0, %v507_v7  ;;  %748 = vst.msk [vmem:[#allocation2 + $0x158] sm:$0xff] %vm704_vm0, %v491_v8  ;;  %v534_v37 = vld [vmem:[%s2603_s29 + $0x2b0] sm:$0xff]  ;;  %v535_v39 = vld [vmem:[%s2603_s29 + $0x2b8] sm:$0xff] }
  0xac   : > { %1254 = vxpose.xlu1.b32.cont [6/16] (narrow) %v982_v59, 8  ;;  %765 = vst.msk [vmem:[#allocation2 + $0x1e0] sm:$0xff] %vm704_vm0, %v508_v9  ;;  %749 = vst.msk [vmem:[#allocation2 + $0x160] sm:$0xff] %vm704_vm0, %v492_v10  ;;  %v518_v38 = vld [vmem:[%s2603_s29 + $0x230] sm:$0xff]  ;;  %v519_v40 = vld [vmem:[%s2603_s29 + $0x238] sm:$0xff] }
  0xad   : > { %1222 = vxpose.xlu0.b32.cont [6/16] (narrow) %v966_v60, 8  ;;  %766 = vst.msk [vmem:[#allocation2 + $0x1e8] sm:$0xff] %vm704_vm0, %v509_v11  ;;  %750 = vst.msk [vmem:[#allocation2 + $0x168] sm:$0xff] %vm704_vm0, %v493_v12  ;;  %v536_v41 = vld [vmem:[%s2603_s29 + $0x2c0] sm:$0xff]  ;;  %v537_v43 = vld [vmem:[%s2603_s29 + $0x2c8] sm:$0xff] }
  0xae   : > { %767 = vst.msk [vmem:[#allocation2 + $0x1f0] sm:$0xff] %vm704_vm0, %v510_v15  ;;  %751 = vst.msk [vmem:[#allocation2 + $0x170] sm:$0xff] %vm704_vm0, %v494_v16  ;;  %v520_v42 = vld [vmem:[%s2603_s29 + $0x240] sm:$0xff]  ;;  %v521_v44 = vld [vmem:[%s2603_s29 + $0x248] sm:$0xff] }
  0xaf   : > { %768 = vst.msk [vmem:[#allocation2 + $0x1f8] sm:$0xff] %vm704_vm0, %v511_v17  ;;  %752 = vst.msk [vmem:[#allocation2 + $0x178] sm:$0xff] %vm704_vm0, %v495_v18  ;;  %v989_v45 = vld [vmem:[#allocation2 + $0xe0] sm:$0xff]  ;;  %v538_v46 = vld [vmem:[%s2603_s29 + $0x2d0] sm:$0xff] }
  0xb0   : > { %1255 = vxpose.xlu1.b32.cont [7/16] (narrow) %v983_v61, 8  ;;  %785 = vst.msk [vmem:[#allocation2 + $0x280] sm:$0xff] %vm704_vm0, %v528_v19  ;;  %769 = vst.msk [vmem:[#allocation2 + $0x200] sm:$0xff] %vm704_vm0, %v512_v20  ;;  %v522_v47 = vld [vmem:[%s2603_s29 + $0x250] sm:$0xff]  ;;  %v539_v48 = vld [vmem:[%s2603_s29 + $0x2d8] sm:$0xff] }
  0xb1   : > { %1223 = vxpose.xlu0.b32.cont [7/16] (narrow) %v967_v62, 8  ;;  %786 = vst.msk [vmem:[#allocation2 + $0x288] sm:$0xff] %vm704_vm0, %v529_v21  ;;  %770 = vst.msk [vmem:[#allocation2 + $0x208] sm:$0xff] %vm704_vm0, %v513_v22  ;;  %v523_v49 = vld [vmem:[%s2603_s29 + $0x258] sm:$0xff]  ;;  %v540_v50 = vld [vmem:[%s2603_s29 + $0x2e0] sm:$0xff] }
  0xb2   : > { %787 = vst.msk [vmem:[#allocation2 + $0x290] sm:$0xff] %vm704_vm0, %v530_v23  ;;  %771 = vst.msk [vmem:[#allocation2 + $0x210] sm:$0xff] %vm704_vm0, %v514_v24  ;;  %v524_v51 = vld [vmem:[%s2603_s29 + $0x260] sm:$0xff]  ;;  %v541_v53 = vld [vmem:[%s2603_s29 + $0x2e8] sm:$0xff] }
  0xb3   : > { %788 = vst.msk [vmem:[#allocation2 + $0x298] sm:$0xff] %vm704_vm0, %v531_v25  ;;  %772 = vst.msk [vmem:[#allocation2 + $0x218] sm:$0xff] %vm704_vm0, %v515_v26  ;;  %v973_v52 = vld [vmem:[#allocation2 + $0x60] sm:$0xff]  ;;  %v525_v54 = vld [vmem:[%s2603_s29 + $0x268] sm:$0xff] }
  0xb4   : > { %1256 = vxpose.xlu1.b32.cont [8/16] (narrow) %v984_v63, 8  ;;  %789 = vst.msk [vmem:[#allocation2 + $0x2a0] sm:$0xff] %vm704_vm0, %v532_v33  ;;  %773 = vst.msk [vmem:[#allocation2 + $0x220] sm:$0xff] %vm704_vm0, %v516_v34  ;;  %v990_v55 = vld [vmem:[#allocation2 + $0xe8] sm:$0xff]  ;;  %v991_v57 = vld [vmem:[#allocation2 + $0xf0] sm:$0xff] }
  0xb5   : > { %1224 = vxpose.xlu0.b32.cont [8/16] (narrow) %v968_v0, 8  ;;  %790 = vst.msk [vmem:[#allocation2 + $0x2a8] sm:$0xff] %vm704_vm0, %v533_v35  ;;  %774 = vst.msk [vmem:[#allocation2 + $0x228] sm:$0xff] %vm704_vm0, %v517_v36  ;;  %v974_v56 = vld [vmem:[#allocation2 + $0x68] sm:$0xff]  ;;  %v975_v58 = vld [vmem:[#allocation2 + $0x70] sm:$0xff] }
  0xb6   : > { %791 = vst.msk [vmem:[#allocation2 + $0x2b0] sm:$0xff] %vm704_vm0, %v534_v37  ;;  %775 = vst.msk [vmem:[#allocation2 + $0x230] sm:$0xff] %vm704_vm0, %v518_v38  ;;  %v542_v59 = vld [vmem:[%s2603_s29 + $0x2f0] sm:$0xff]  ;;  %v543_v61 = vld [vmem:[%s2603_s29 + $0x2f8] sm:$0xff] }
  0xb7   : > { %792 = vst.msk [vmem:[#allocation2 + $0x2b8] sm:$0xff] %vm704_vm0, %v535_v39  ;;  %776 = vst.msk [vmem:[#allocation2 + $0x238] sm:$0xff] %vm704_vm0, %v519_v40  ;;  %v526_v60 = vld [vmem:[%s2603_s29 + $0x270] sm:$0xff]  ;;  %v527_v62 = vld [vmem:[%s2603_s29 + $0x278] sm:$0xff] }
  0xb8   : > { %1257 = vxpose.xlu1.b32.cont [9/16] (narrow) %v985_v13, 8  ;;  %793 = vst.msk [vmem:[#allocation2 + $0x2c0] sm:$0xff] %vm704_vm0, %v536_v41  ;;  %777 = vst.msk [vmem:[#allocation2 + $0x240] sm:$0xff] %vm704_vm0, %v520_v42  ;;  %v560_v63 = vld [vmem:[%s2603_s29 + $0x380] sm:$0xff]  ;;  %v992_v1 = vld [vmem:[#allocation2 + $0xf8] sm:$0xff] }
  0xb9   : > { %1225 = vxpose.xlu0.b32.cont [9/16] (narrow) %v969_v14, 8  ;;  %794 = vst.msk [vmem:[#allocation2 + $0x2c8] sm:$0xff] %vm704_vm0, %v537_v43  ;;  %778 = vst.msk [vmem:[#allocation2 + $0x248] sm:$0xff] %vm704_vm0, %v521_v44  ;;  %v544_v0 = vld [vmem:[%s2603_s29 + $0x300] sm:$0xff]  ;;  %v976_v2 = vld [vmem:[#allocation2 + $0x78] sm:$0xff] }
  0xba   : > { %795 = vst.msk [vmem:[#allocation2 + $0x2d0] sm:$0xff] %vm704_vm0, %v538_v46  ;;  %779 = vst.msk [vmem:[#allocation2 + $0x250] sm:$0xff] %vm704_vm0, %v522_v47  ;;  %v561_v3 = vld [vmem:[%s2603_s29 + $0x388] sm:$0xff]  ;;  %v1009_v5 = vld [vmem:[#allocation2 + $0x180] sm:$0xff] }
  0xbb   : > { %796 = vst.msk [vmem:[#allocation2 + $0x2d8] sm:$0xff] %vm704_vm0, %v539_v48  ;;  %780 = vst.msk [vmem:[#allocation2 + $0x258] sm:$0xff] %vm704_vm0, %v523_v49  ;;  %v545_v4 = vld [vmem:[%s2603_s29 + $0x308] sm:$0xff]  ;;  %v993_v6 = vld [vmem:[#allocation2 + $0x100] sm:$0xff] }
  0xbc   : > { %1258 = vxpose.xlu1.b32.cont [10/16] (narrow) %v986_v27, 8  ;;  %797 = vst.msk [vmem:[#allocation2 + $0x2e0] sm:$0xff] %vm704_vm0, %v540_v50  ;;  %781 = vst.msk [vmem:[#allocation2 + $0x260] sm:$0xff] %vm704_vm0, %v524_v51  ;;  %v562_v7 = vld [vmem:[%s2603_s29 + $0x390] sm:$0xff]  ;;  %v1010_v9 = vld [vmem:[#allocation2 + $0x188] sm:$0xff] }
  0xbd   : > { %1226 = vxpose.xlu0.b32.cont [10/16] (narrow) %v970_v28, 8  ;;  %798 = vst.msk [vmem:[#allocation2 + $0x2e8] sm:$0xff] %vm704_vm0, %v541_v53  ;;  %782 = vst.msk [vmem:[#allocation2 + $0x268] sm:$0xff] %vm704_vm0, %v525_v54  ;;  %v546_v8 = vld [vmem:[%s2603_s29 + $0x310] sm:$0xff]  ;;  %v994_v10 = vld [vmem:[#allocation2 + $0x108] sm:$0xff] }
  0xbe   : > { %799 = vst.msk [vmem:[#allocation2 + $0x2f0] sm:$0xff] %vm704_vm0, %v542_v59  ;;  %783 = vst.msk [vmem:[#allocation2 + $0x270] sm:$0xff] %vm704_vm0, %v526_v60  ;;  %v563_v11 = vld [vmem:[%s2603_s29 + $0x398] sm:$0xff]  ;;  %v1011_v13 = vld [vmem:[#allocation2 + $0x190] sm:$0xff] }
  0xbf   : > { %800 = vst.msk [vmem:[#allocation2 + $0x2f8] sm:$0xff] %vm704_vm0, %v543_v61  ;;  %784 = vst.msk [vmem:[#allocation2 + $0x278] sm:$0xff] %vm704_vm0, %v527_v62  ;;  %v547_v12 = vld [vmem:[%s2603_s29 + $0x318] sm:$0xff]  ;;  %v995_v14 = vld [vmem:[#allocation2 + $0x110] sm:$0xff] }
  0xc0   : > { %1259 = vxpose.xlu1.b32.cont [11/16] (narrow) %v987_v29, 8  ;;  %817 = vst.msk [vmem:[#allocation2 + $0x380] sm:$0xff] %vm704_vm0, %v560_v63  ;;  %801 = vst.msk [vmem:[#allocation2 + $0x300] sm:$0xff] %vm704_vm0, %v544_v0  ;;  %v564_v15 = vld [vmem:[%s2603_s29 + $0x3a0] sm:$0xff]  ;;  %v1012_v17 = vld [vmem:[#allocation2 + $0x198] sm:$0xff] }
  0xc1   : > { %1227 = vxpose.xlu0.b32.cont [11/16] (narrow) %v971_v30, 8  ;;  %818 = vst.msk [vmem:[#allocation2 + $0x388] sm:$0xff] %vm704_vm0, %v561_v3  ;;  %802 = vst.msk [vmem:[#allocation2 + $0x308] sm:$0xff] %vm704_vm0, %v545_v4  ;;  %v548_v16 = vld [vmem:[%s2603_s29 + $0x320] sm:$0xff]  ;;  %v996_v18 = vld [vmem:[#allocation2 + $0x118] sm:$0xff] }
  0xc2   : > { %819 = vst.msk [vmem:[#allocation2 + $0x390] sm:$0xff] %vm704_vm0, %v562_v7  ;;  %803 = vst.msk [vmem:[#allocation2 + $0x310] sm:$0xff] %vm704_vm0, %v546_v8  ;;  %v565_v19 = vld [vmem:[%s2603_s29 + $0x3a8] sm:$0xff]  ;;  %v1013_v21 = vld [vmem:[#allocation2 + $0x1a0] sm:$0xff] }
  0xc3   : > { %820 = vst.msk [vmem:[#allocation2 + $0x398] sm:$0xff] %vm704_vm0, %v563_v11  ;;  %804 = vst.msk [vmem:[#allocation2 + $0x318] sm:$0xff] %vm704_vm0, %v547_v12  ;;  %v549_v20 = vld [vmem:[%s2603_s29 + $0x328] sm:$0xff]  ;;  %v997_v22 = vld [vmem:[#allocation2 + $0x120] sm:$0xff] }
  0xc4   : > { %1260 = vxpose.xlu1.b32.cont [12/16] (narrow) %v988_v31, 8  ;;  %821 = vst.msk [vmem:[#allocation2 + $0x3a0] sm:$0xff] %vm704_vm0, %v564_v15  ;;  %805 = vst.msk [vmem:[#allocation2 + $0x320] sm:$0xff] %vm704_vm0, %v548_v16  ;;  %v566_v23 = vld [vmem:[%s2603_s29 + $0x3b0] sm:$0xff]  ;;  %v1014_v25 = vld [vmem:[#allocation2 + $0x1a8] sm:$0xff] }
  0xc5   : > { %1228 = vxpose.xlu0.b32.cont [12/16] (narrow) %v972_v32, 8  ;;  %822 = vst.msk [vmem:[#allocation2 + $0x3a8] sm:$0xff] %vm704_vm0, %v565_v19  ;;  %806 = vst.msk [vmem:[#allocation2 + $0x328] sm:$0xff] %vm704_vm0, %v549_v20  ;;  %v550_v24 = vld [vmem:[%s2603_s29 + $0x330] sm:$0xff]  ;;  %v998_v26 = vld [vmem:[#allocation2 + $0x128] sm:$0xff] }
  0xc6   : > { %823 = vst.msk [vmem:[#allocation2 + $0x3b0] sm:$0xff] %vm704_vm0, %v566_v23  ;;  %807 = vst.msk [vmem:[#allocation2 + $0x330] sm:$0xff] %vm704_vm0, %v550_v24  ;;  %v567_v27 = vld [vmem:[%s2603_s29 + $0x3b8] sm:$0xff]  ;;  %v1015_v29 = vld [vmem:[#allocation2 + $0x1b0] sm:$0xff] }
  0xc7   : > { %824 = vst.msk [vmem:[#allocation2 + $0x3b8] sm:$0xff] %vm704_vm0, %v567_v27  ;;  %v551_v28 = vld [vmem:[%s2603_s29 + $0x338] sm:$0xff]  ;;  %v999_v30 = vld [vmem:[#allocation2 + $0x130] sm:$0xff]  ;;  %v568_v31 = vld [vmem:[%s2603_s29 + $0x3c0] sm:$0xff] }
  0xc8   : > { %1261 = vxpose.xlu1.b32.cont [13/16] (narrow) %v989_v45, 8  ;;  %808 = vst.msk [vmem:[#allocation2 + $0x338] sm:$0xff] %vm704_vm0, %v551_v28  ;;  %v552_v32 = vld [vmem:[%s2603_s29 + $0x340] sm:$0xff]  ;;  %825 = vst.msk [vmem:[#allocation2 + $0x3c0] sm:$0xff] %vm704_vm0, %v568_v31  ;;  %v1016_v33 = vld [vmem:[#allocation2 + $0x1b8] sm:$0xff] }
  0xc9   : > { %1229 = vxpose.xlu0.b32.cont [13/16] (narrow) %v973_v52, 8  ;;  %809 = vst.msk [vmem:[#allocation2 + $0x340] sm:$0xff] %vm704_vm0, %v552_v32  ;;  %v1000_v34 = vld [vmem:[#allocation2 + $0x138] sm:$0xff]  ;;  %v569_v35 = vld [vmem:[%s2603_s29 + $0x3c8] sm:$0xff]  ;;  %v1017_v37 = vld [vmem:[#allocation2 + $0x1c0] sm:$0xff] }
  0xca   : > { %v553_v36 = vld [vmem:[%s2603_s29 + $0x348] sm:$0xff]  ;;  %826 = vst.msk [vmem:[#allocation2 + $0x3c8] sm:$0xff] %vm704_vm0, %v569_v35  ;;  %v1001_v38 = vld [vmem:[#allocation2 + $0x140] sm:$0xff]  ;;  %v570_v39 = vld [vmem:[%s2603_s29 + $0x3d0] sm:$0xff] }
  0xcb   : > { %810 = vst.msk [vmem:[#allocation2 + $0x348] sm:$0xff] %vm704_vm0, %v553_v36  ;;  %827 = vst.msk [vmem:[#allocation2 + $0x3d0] sm:$0xff] %vm704_vm0, %v570_v39  ;;  %v554_v40 = vld [vmem:[%s2603_s29 + $0x350] sm:$0xff]  ;;  %v1018_v41 = vld [vmem:[#allocation2 + $0x1c8] sm:$0xff] }
  0xcc   : > { %1262 = vxpose.xlu1.b32.cont [14/16] (narrow) %v990_v55, 8  ;;  %v1002_v42 = vld [vmem:[#allocation2 + $0x148] sm:$0xff]  ;;  %811 = vst.msk [vmem:[#allocation2 + $0x350] sm:$0xff] %vm704_vm0, %v554_v40  ;;  %v571_v43 = vld [vmem:[%s2603_s29 + $0x3d8] sm:$0xff]  ;;  %v1019_v45 = vld [vmem:[#allocation2 + $0x1d0] sm:$0xff] }
  0xcd   : > { %1230 = vxpose.xlu0.b32.cont [14/16] (narrow) %v974_v56, 8  ;;  %828 = vst.msk [vmem:[#allocation2 + $0x3d8] sm:$0xff] %vm704_vm0, %v571_v43  ;;  %v555_v44 = vld [vmem:[%s2603_s29 + $0x358] sm:$0xff]  ;;  %v1003_v46 = vld [vmem:[#allocation2 + $0x150] sm:$0xff]  ;;  %v572_v47 = vld [vmem:[%s2603_s29 + $0x3e0] sm:$0xff] }
  0xce   : > { %812 = vst.msk [vmem:[#allocation2 + $0x358] sm:$0xff] %vm704_vm0, %v555_v44  ;;  %v556_v48 = vld [vmem:[%s2603_s29 + $0x360] sm:$0xff]  ;;  %829 = vst.msk [vmem:[#allocation2 + $0x3e0] sm:$0xff] %vm704_vm0, %v572_v47  ;;  %v1020_v49 = vld [vmem:[#allocation2 + $0x1d8] sm:$0xff] }
  0xcf   : > { %813 = vst.msk [vmem:[#allocation2 + $0x360] sm:$0xff] %vm704_vm0, %v556_v48  ;;  %v1004_v50 = vld [vmem:[#allocation2 + $0x158] sm:$0xff]  ;;  %v573_v51 = vld [vmem:[%s2603_s29 + $0x3e8] sm:$0xff]  ;;  %v1021_v53 = vld [vmem:[#allocation2 + $0x1e0] sm:$0xff] }
  0xd0   : > { %1263 = vxpose.xlu1.b32.cont [15/16] (narrow) %v991_v57, 8  ;;  %v557_v52 = vld [vmem:[%s2603_s29 + $0x368] sm:$0xff]  ;;  %830 = vst.msk [vmem:[#allocation2 + $0x3e8] sm:$0xff] %vm704_vm0, %v573_v51  ;;  %v1005_v54 = vld [vmem:[#allocation2 + $0x160] sm:$0xff]  ;;  %v574_v55 = vld [vmem:[%s2603_s29 + $0x3f0] sm:$0xff] }
  0xd1   : > { %1231 = vxpose.xlu0.b32.cont [15/16] (narrow) %v975_v58, 8  ;;  %814 = vst.msk [vmem:[#allocation2 + $0x368] sm:$0xff] %vm704_vm0, %v557_v52  ;;  %831 = vst.msk [vmem:[#allocation2 + $0x3f0] sm:$0xff] %vm704_vm0, %v574_v55  ;;  %v558_v56 = vld [vmem:[%s2603_s29 + $0x370] sm:$0xff]  ;;  %v1022_v57 = vld [vmem:[#allocation2 + $0x1e8] sm:$0xff] }
  0xd2   : > { %v1006_v58 = vld [vmem:[#allocation2 + $0x168] sm:$0xff]  ;;  %815 = vst.msk [vmem:[#allocation2 + $0x370] sm:$0xff] %vm704_vm0, %v558_v56  ;;  %v575_v59 = vld [vmem:[%s2603_s29 + $0x3f8] sm:$0xff]  ;;  %v1023_v61 = vld [vmem:[#allocation2 + $0x1f0] sm:$0xff] }
  0xd3   : > { %832 = vst.msk [vmem:[#allocation2 + $0x3f8] sm:$0xff] %vm704_vm0, %v575_v59  ;;  %v559_v60 = vld [vmem:[%s2603_s29 + $0x378] sm:$0xff]  ;;  %v1007_v62 = vld [vmem:[#allocation2 + $0x170] sm:$0xff]  ;;  %v592_v63 = vld [vmem:[%s2603_s29 + $0x480] sm:$0xff] }
  0xd4   : > { %1264 = vxpose.xlu1.b32.end [16/16] (narrow) %v992_v1, 8  ;;  %816 = vst.msk [vmem:[#allocation2 + $0x378] sm:$0xff] %vm704_vm0, %v559_v60  ;;  %v576_v0 = vld [vmem:[%s2603_s29 + $0x400] sm:$0xff]  ;;  %849 = vst.msk [vmem:[#allocation2 + $0x480] sm:$0xff] %vm704_vm0, %v592_v63  ;;  %v1024_v1 = vld [vmem:[#allocation2 + $0x1f8] sm:$0xff] }
  0xd5   : > { %1232 = vxpose.xlu0.b32.end [16/16] (narrow) %v976_v2, 8  ;;  %833 = vst.msk [vmem:[#allocation2 + $0x400] sm:$0xff] %vm704_vm0, %v576_v0  ;;  %v1008_v2 = vld [vmem:[#allocation2 + $0x178] sm:$0xff]  ;;  %v593_v3 = vld [vmem:[%s2603_s29 + $0x488] sm:$0xff]  ;;  %v594_v7 = vld [vmem:[%s2603_s29 + $0x490] sm:$0xff] }
  0xd6   : > { %v577_v4 = vld [vmem:[%s2603_s29 + $0x408] sm:$0xff]  ;;  %850 = vst.msk [vmem:[#allocation2 + $0x488] sm:$0xff] %vm704_vm0, %v593_v3  ;;  %851 = vst.msk [vmem:[#allocation2 + $0x490] sm:$0xff] %vm704_vm0, %v594_v7  ;;  %v578_v8 = vld [vmem:[%s2603_s29 + $0x410] sm:$0xff] }
  0xd7   : > { %834 = vst.msk [vmem:[#allocation2 + $0x408] sm:$0xff] %vm704_vm0, %v577_v4  ;;  %835 = vst.msk [vmem:[#allocation2 + $0x410] sm:$0xff] %vm704_vm0, %v578_v8  ;;  %v595_v11 = vld [vmem:[%s2603_s29 + $0x498] sm:$0xff]  ;;  %v596_v15 = vld [vmem:[%s2603_s29 + $0x4a0] sm:$0xff] }
  0xd8   : > { %1313 = vxpose.xlu1.b32.start [1/16] (narrow) %v1009_v5, 8  ;;  %v1041_v5 = vld [vmem:[#allocation2 + $0x280] sm:$0xff]  ;;  %852 = vst.msk [vmem:[#allocation2 + $0x498] sm:$0xff] %vm704_vm0, %v595_v11  ;;  %v579_v12 = vld [vmem:[%s2603_s29 + $0x418] sm:$0xff]  ;;  %853 = vst.msk [vmem:[#allocation2 + $0x4a0] sm:$0xff] %vm704_vm0, %v596_v15 }
  0xd9   : > { %1281 = vxpose.xlu0.b32.start [1/16] (narrow) %v993_v6, 8  ;;  %v1025_v6 = vld [vmem:[#allocation2 + $0x200] sm:$0xff]  ;;  %836 = vst.msk [vmem:[#allocation2 + $0x418] sm:$0xff] %vm704_vm0, %v579_v12  ;;  %v597_v19 = vld [vmem:[%s2603_s29 + $0x4a8] sm:$0xff]  ;;  %v598_v23 = vld [vmem:[%s2603_s29 + $0x4b0] sm:$0xff] }
  0xda   : > { %v580_v16 = vld [vmem:[%s2603_s29 + $0x420] sm:$0xff]  ;;  %v581_v20 = vld [vmem:[%s2603_s29 + $0x428] sm:$0xff]  ;;  %854 = vst.msk [vmem:[#allocation2 + $0x4a8] sm:$0xff] %vm704_vm0, %v597_v19  ;;  %855 = vst.msk [vmem:[#allocation2 + $0x4b0] sm:$0xff] %vm704_vm0, %v598_v23 }
  0xdb   : > { %837 = vst.msk [vmem:[#allocation2 + $0x420] sm:$0xff] %vm704_vm0, %v580_v16  ;;  %838 = vst.msk [vmem:[#allocation2 + $0x428] sm:$0xff] %vm704_vm0, %v581_v20  ;;  %v582_v24 = vld [vmem:[%s2603_s29 + $0x430] sm:$0xff]  ;;  %v599_v27 = vld [vmem:[%s2603_s29 + $0x4b8] sm:$0xff] }
  0xdc   : > { %1314 = vxpose.xlu1.b32.cont [2/16] (narrow) %v1010_v9, 8  ;;  %v1042_v9 = vld [vmem:[#allocation2 + $0x288] sm:$0xff]  ;;  %839 = vst.msk [vmem:[#allocation2 + $0x430] sm:$0xff] %vm704_vm0, %v582_v24  ;;  %856 = vst.msk [vmem:[#allocation2 + $0x4b8] sm:$0xff] %vm704_vm0, %v599_v27  ;;  %v583_v28 = vld [vmem:[%s2603_s29 + $0x438] sm:$0xff] }
  0xdd   : > { %1282 = vxpose.xlu0.b32.cont [2/16] (narrow) %v994_v10, 8  ;;  %v1026_v10 = vld [vmem:[#allocation2 + $0x208] sm:$0xff]  ;;  %840 = vst.msk [vmem:[#allocation2 + $0x438] sm:$0xff] %vm704_vm0, %v583_v28  ;;  %v600_v31 = vld [vmem:[%s2603_s29 + $0x4c0] sm:$0xff]  ;;  %v602_v39 = vld [vmem:[%s2603_s29 + $0x4d0] sm:$0xff] }
  0xde   : > { %v584_v32 = vld [vmem:[%s2603_s29 + $0x440] sm:$0xff]  ;;  %857 = vst.msk [vmem:[#allocation2 + $0x4c0] sm:$0xff] %vm704_vm0, %v600_v31  ;;  %v601_v35 = vld [vmem:[%s2603_s29 + $0x4c8] sm:$0xff]  ;;  %859 = vst.msk [vmem:[#allocation2 + $0x4d0] sm:$0xff] %vm704_vm0, %v602_v39 }
  0xdf   : > { %841 = vst.msk [vmem:[#allocation2 + $0x440] sm:$0xff] %vm704_vm0, %v584_v32  ;;  %v585_v36 = vld [vmem:[%s2603_s29 + $0x448] sm:$0xff]  ;;  %858 = vst.msk [vmem:[#allocation2 + $0x4c8] sm:$0xff] %vm704_vm0, %v601_v35  ;;  %v586_v40 = vld [vmem:[%s2603_s29 + $0x450] sm:$0xff] }
  0xe0   : > { %1315 = vxpose.xlu1.b32.cont [3/16] (narrow) %v1011_v13, 8  ;;  %v1043_v13 = vld [vmem:[#allocation2 + $0x290] sm:$0xff]  ;;  %842 = vst.msk [vmem:[#allocation2 + $0x448] sm:$0xff] %vm704_vm0, %v585_v36  ;;  %843 = vst.msk [vmem:[#allocation2 + $0x450] sm:$0xff] %vm704_vm0, %v586_v40  ;;  %v603_v43 = vld [vmem:[%s2603_s29 + $0x4d8] sm:$0xff] }
  0xe1   : > { %1283 = vxpose.xlu0.b32.cont [3/16] (narrow) %v995_v14, 8  ;;  %v1027_v14 = vld [vmem:[#allocation2 + $0x210] sm:$0xff]  ;;  %860 = vst.msk [vmem:[#allocation2 + $0x4d8] sm:$0xff] %vm704_vm0, %v603_v43  ;;  %v587_v44 = vld [vmem:[%s2603_s29 + $0x458] sm:$0xff]  ;;  %v604_v47 = vld [vmem:[%s2603_s29 + $0x4e0] sm:$0xff] }
  0xe2   : > { %844 = vst.msk [vmem:[#allocation2 + $0x458] sm:$0xff] %vm704_vm0, %v587_v44  ;;  %v588_v48 = vld [vmem:[%s2603_s29 + $0x460] sm:$0xff]  ;;  %861 = vst.msk [vmem:[#allocation2 + $0x4e0] sm:$0xff] %vm704_vm0, %v604_v47  ;;  %v605_v51 = vld [vmem:[%s2603_s29 + $0x4e8] sm:$0xff] }
  0xe3   : > { %845 = vst.msk [vmem:[#allocation2 + $0x460] sm:$0xff] %vm704_vm0, %v588_v48  ;;  %v589_v52 = vld [vmem:[%s2603_s29 + $0x468] sm:$0xff]  ;;  %862 = vst.msk [vmem:[#allocation2 + $0x4e8] sm:$0xff] %vm704_vm0, %v605_v51  ;;  %v606_v55 = vld [vmem:[%s2603_s29 + $0x4f0] sm:$0xff] }
  0xe4   : > { %1316 = vxpose.xlu1.b32.cont [4/16] (narrow) %v1012_v17, 8  ;;  %v1044_v17 = vld [vmem:[#allocation2 + $0x298] sm:$0xff]  ;;  %846 = vst.msk [vmem:[#allocation2 + $0x468] sm:$0xff] %vm704_vm0, %v589_v52  ;;  %863 = vst.msk [vmem:[#allocation2 + $0x4f0] sm:$0xff] %vm704_vm0, %v606_v55  ;;  %v590_v56 = vld [vmem:[%s2603_s29 + $0x470] sm:$0xff] }
  0xe5   : > { %1284 = vxpose.xlu0.b32.cont [4/16] (narrow) %v996_v18, 8  ;;  %v1028_v18 = vld [vmem:[#allocation2 + $0x218] sm:$0xff]  ;;  %847 = vst.msk [vmem:[#allocation2 + $0x470] sm:$0xff] %vm704_vm0, %v590_v56  ;;  %v624_v63 = vld [vmem:[%s2603_s29 + $0x580] sm:$0xff]  ;;  %v625_v3 = vld [vmem:[%s2603_s29 + $0x588] sm:$0xff] }
  0xe6   : > { %v607_v59 = vld [vmem:[%s2603_s29 + $0x4f8] sm:$0xff]  ;;  %v608_v0 = vld [vmem:[%s2603_s29 + $0x500] sm:$0xff]  ;;  %881 = vst.msk [vmem:[#allocation2 + $0x580] sm:$0xff] %vm704_vm0, %v624_v63  ;;  %v609_v4 = vld [vmem:[%s2603_s29 + $0x508] sm:$0xff] }
  0xe7   : > { %864 = vst.msk [vmem:[#allocation2 + $0x4f8] sm:$0xff] %vm704_vm0, %v607_v59  ;;  %v591_v60 = vld [vmem:[%s2603_s29 + $0x478] sm:$0xff]  ;;  %865 = vst.msk [vmem:[#allocation2 + $0x500] sm:$0xff] %vm704_vm0, %v608_v0  ;;  %v626_v7 = vld [vmem:[%s2603_s29 + $0x590] sm:$0xff] }
  0xe8   : > { %1317 = vxpose.xlu1.b32.cont [5/16] (narrow) %v1013_v21, 8  ;;  %v1045_v21 = vld [vmem:[#allocation2 + $0x2a0] sm:$0xff]  ;;  %848 = vst.msk [vmem:[#allocation2 + $0x478] sm:$0xff] %vm704_vm0, %v591_v60  ;;  %882 = vst.msk [vmem:[#allocation2 + $0x588] sm:$0xff] %vm704_vm0, %v625_v3  ;;  %v610_v8 = vld [vmem:[%s2603_s29 + $0x510] sm:$0xff] }
  0xe9   : > { %1285 = vxpose.xlu0.b32.cont [5/16] (narrow) %v997_v22, 8  ;;  %v1029_v22 = vld [vmem:[#allocation2 + $0x220] sm:$0xff]  ;;  %866 = vst.msk [vmem:[#allocation2 + $0x508] sm:$0xff] %vm704_vm0, %v609_v4  ;;  %883 = vst.msk [vmem:[#allocation2 + $0x590] sm:$0xff] %vm704_vm0, %v626_v7  ;;  %v627_v11 = vld [vmem:[%s2603_s29 + $0x598] sm:$0xff] }
  0xea   : > { %867 = vst.msk [vmem:[#allocation2 + $0x510] sm:$0xff] %vm704_vm0, %v610_v8  ;;  %884 = vst.msk [vmem:[#allocation2 + $0x598] sm:$0xff] %vm704_vm0, %v627_v11  ;;  %v611_v12 = vld [vmem:[%s2603_s29 + $0x518] sm:$0xff]  ;;  %v628_v15 = vld [vmem:[%s2603_s29 + $0x5a0] sm:$0xff] }
  0xeb   : > { %868 = vst.msk [vmem:[#allocation2 + $0x518] sm:$0xff] %vm704_vm0, %v611_v12  ;;  %v612_v16 = vld [vmem:[%s2603_s29 + $0x520] sm:$0xff]  ;;  %885 = vst.msk [vmem:[#allocation2 + $0x5a0] sm:$0xff] %vm704_vm0, %v628_v15  ;;  %v629_v19 = vld [vmem:[%s2603_s29 + $0x5a8] sm:$0xff] }
  0xec   : > { %1318 = vxpose.xlu1.b32.cont [6/16] (narrow) %v1014_v25, 8  ;;  %v1046_v25 = vld [vmem:[#allocation2 + $0x2a8] sm:$0xff]  ;;  %869 = vst.msk [vmem:[#allocation2 + $0x520] sm:$0xff] %vm704_vm0, %v612_v16  ;;  %886 = vst.msk [vmem:[#allocation2 + $0x5a8] sm:$0xff] %vm704_vm0, %v629_v19  ;;  %v630_v23 = vld [vmem:[%s2603_s29 + $0x5b0] sm:$0xff] }
  0xed   : > { %1286 = vxpose.xlu0.b32.cont [6/16] (narrow) %v998_v26, 8  ;;  %v1030_v26 = vld [vmem:[#allocation2 + $0x228] sm:$0xff]  ;;  %887 = vst.msk [vmem:[#allocation2 + $0x5b0] sm:$0xff] %vm704_vm0, %v630_v23  ;;  %v614_v24 = vld [vmem:[%s2603_s29 + $0x530] sm:$0xff]  ;;  %v631_v27 = vld [vmem:[%s2603_s29 + $0x5b8] sm:$0xff] }
  0xee   : > { %v613_v20 = vld [vmem:[%s2603_s29 + $0x528] sm:$0xff]  ;;  %871 = vst.msk [vmem:[#allocation2 + $0x530] sm:$0xff] %vm704_vm0, %v614_v24  ;;  %888 = vst.msk [vmem:[#allocation2 + $0x5b8] sm:$0xff] %vm704_vm0, %v631_v27  ;;  %v615_v28 = vld [vmem:[%s2603_s29 + $0x538] sm:$0xff] }
  0xef   : > { %870 = vst.msk [vmem:[#allocation2 + $0x528] sm:$0xff] %vm704_vm0, %v613_v20  ;;  %872 = vst.msk [vmem:[#allocation2 + $0x538] sm:$0xff] %vm704_vm0, %v615_v28  ;;  %v632_v31 = vld [vmem:[%s2603_s29 + $0x5c0] sm:$0xff]  ;;  %v633_v35 = vld [vmem:[%s2603_s29 + $0x5c8] sm:$0xff] }
  0xf0   : > { %1319 = vxpose.xlu1.b32.cont [7/16] (narrow) %v1015_v29, 8  ;;  %v1047_v29 = vld [vmem:[#allocation2 + $0x2b0] sm:$0xff]  ;;  %v616_v32 = vld [vmem:[%s2603_s29 + $0x540] sm:$0xff]  ;;  %889 = vst.msk [vmem:[#allocation2 + $0x5c0] sm:$0xff] %vm704_vm0, %v632_v31  ;;  %v617_v36 = vld [vmem:[%s2603_s29 + $0x548] sm:$0xff] }
  0xf1   : > { %1287 = vxpose.xlu0.b32.cont [7/16] (narrow) %v999_v30, 8  ;;  %v1031_v30 = vld [vmem:[#allocation2 + $0x230] sm:$0xff]  ;;  %873 = vst.msk [vmem:[#allocation2 + $0x540] sm:$0xff] %vm704_vm0, %v616_v32  ;;  %890 = vst.msk [vmem:[#allocation2 + $0x5c8] sm:$0xff] %vm704_vm0, %v633_v35  ;;  %v635_v43 = vld [vmem:[%s2603_s29 + $0x5d8] sm:$0xff] }
  0xf2   : > { %874 = vst.msk [vmem:[#allocation2 + $0x548] sm:$0xff] %vm704_vm0, %v617_v36  ;;  %v634_v39 = vld [vmem:[%s2603_s29 + $0x5d0] sm:$0xff]  ;;  %892 = vst.msk [vmem:[#allocation2 + $0x5d8] sm:$0xff] %vm704_vm0, %v635_v43  ;;  %v619_v44 = vld [vmem:[%s2603_s29 + $0x558] sm:$0xff] }
  0xf3   : > { %891 = vst.msk [vmem:[#allocation2 + $0x5d0] sm:$0xff] %vm704_vm0, %v634_v39  ;;  %v618_v40 = vld [vmem:[%s2603_s29 + $0x550] sm:$0xff]  ;;  %876 = vst.msk [vmem:[#allocation2 + $0x558] sm:$0xff] %vm704_vm0, %v619_v44  ;;  %v636_v47 = vld [vmem:[%s2603_s29 + $0x5e0] sm:$0xff] }
  0xf4   : > { %1320 = vxpose.xlu1.b32.cont [8/16] (narrow) %v1016_v33, 8  ;;  %v1048_v33 = vld [vmem:[#allocation2 + $0x2b8] sm:$0xff]  ;;  %875 = vst.msk [vmem:[#allocation2 + $0x550] sm:$0xff] %vm704_vm0, %v618_v40  ;;  %v620_v48 = vld [vmem:[%s2603_s29 + $0x560] sm:$0xff]  ;;  %893 = vst.msk [vmem:[#allocation2 + $0x5e0] sm:$0xff] %vm704_vm0, %v636_v47 }
  0xf5   : > { %1288 = vxpose.xlu0.b32.cont [8/16] (narrow) %v1000_v34, 8  ;;  %v1032_v34 = vld [vmem:[#allocation2 + $0x238] sm:$0xff]  ;;  %877 = vst.msk [vmem:[#allocation2 + $0x560] sm:$0xff] %vm704_vm0, %v620_v48  ;;  %v637_v51 = vld [vmem:[%s2603_s29 + $0x5e8] sm:$0xff]  ;;  %v638_v55 = vld [vmem:[%s2603_s29 + $0x5f0] sm:$0xff] }
  0xf6   : > { %v621_v52 = vld [vmem:[%s2603_s29 + $0x568] sm:$0xff]  ;;  %894 = vst.msk [vmem:[#allocation2 + $0x5e8] sm:$0xff] %vm704_vm0, %v637_v51  ;;  %895 = vst.msk [vmem:[#allocation2 + $0x5f0] sm:$0xff] %vm704_vm0, %v638_v55  ;;  %v622_v56 = vld [vmem:[%s2603_s29 + $0x570] sm:$0xff] }
  0xf7   : > { %878 = vst.msk [vmem:[#allocation2 + $0x568] sm:$0xff] %vm704_vm0, %v621_v52  ;;  %879 = vst.msk [vmem:[#allocation2 + $0x570] sm:$0xff] %vm704_vm0, %v622_v56  ;;  %v639_v59 = vld [vmem:[%s2603_s29 + $0x5f8] sm:$0xff]  ;;  %v656_v63 = vld [vmem:[%s2603_s29 + $0x680] sm:$0xff] }
  0xf8   : > { %1321 = vxpose.xlu1.b32.cont [9/16] (narrow) %v1017_v37, 8  ;;  %v1049_v37 = vld [vmem:[#allocation2 + $0x2c0] sm:$0xff]  ;;  %896 = vst.msk [vmem:[#allocation2 + $0x5f8] sm:$0xff] %vm704_vm0, %v639_v59  ;;  %v623_v60 = vld [vmem:[%s2603_s29 + $0x578] sm:$0xff]  ;;  %913 = vst.msk [vmem:[#allocation2 + $0x680] sm:$0xff] %vm704_vm0, %v656_v63 }
  0xf9   : > { %1289 = vxpose.xlu0.b32.cont [9/16] (narrow) %v1001_v38, 8  ;;  %v1033_v38 = vld [vmem:[#allocation2 + $0x240] sm:$0xff]  ;;  %880 = vst.msk [vmem:[#allocation2 + $0x578] sm:$0xff] %vm704_vm0, %v623_v60  ;;  %v657_v3 = vld [vmem:[%s2603_s29 + $0x688] sm:$0xff]  ;;  %v658_v7 = vld [vmem:[%s2603_s29 + $0x690] sm:$0xff] }
  0xfa   : > { %v640_v0 = vld [vmem:[%s2603_s29 + $0x600] sm:$0xff]  ;;  %v641_v4 = vld [vmem:[%s2603_s29 + $0x608] sm:$0xff]  ;;  %914 = vst.msk [vmem:[#allocation2 + $0x688] sm:$0xff] %vm704_vm0, %v657_v3  ;;  %915 = vst.msk [vmem:[#allocation2 + $0x690] sm:$0xff] %vm704_vm0, %v658_v7 }
  0xfb   : > { %897 = vst.msk [vmem:[#allocation2 + $0x600] sm:$0xff] %vm704_vm0, %v640_v0  ;;  %898 = vst.msk [vmem:[#allocation2 + $0x608] sm:$0xff] %vm704_vm0, %v641_v4  ;;  %v642_v8 = vld [vmem:[%s2603_s29 + $0x610] sm:$0xff]  ;;  %v659_v11 = vld [vmem:[%s2603_s29 + $0x698] sm:$0xff] }
  0xfc   : > { %1322 = vxpose.xlu1.b32.cont [10/16] (narrow) %v1018_v41, 8  ;;  %v1050_v41 = vld [vmem:[#allocation2 + $0x2c8] sm:$0xff]  ;;  %899 = vst.msk [vmem:[#allocation2 + $0x610] sm:$0xff] %vm704_vm0, %v642_v8  ;;  %916 = vst.msk [vmem:[#allocation2 + $0x698] sm:$0xff] %vm704_vm0, %v659_v11  ;;  %v643_v12 = vld [vmem:[%s2603_s29 + $0x618] sm:$0xff] }
  0xfd   : > { %1290 = vxpose.xlu0.b32.cont [10/16] (narrow) %v1002_v42, 8  ;;  %v1034_v42 = vld [vmem:[#allocation2 + $0x248] sm:$0xff]  ;;  %900 = vst.msk [vmem:[#allocation2 + $0x618] sm:$0xff] %vm704_vm0, %v643_v12  ;;  %v660_v15 = vld [vmem:[%s2603_s29 + $0x6a0] sm:$0xff]  ;;  %v662_v23 = vld [vmem:[%s2603_s29 + $0x6b0] sm:$0xff] }
  0xfe   : > { %v644_v16 = vld [vmem:[%s2603_s29 + $0x620] sm:$0xff]  ;;  %917 = vst.msk [vmem:[#allocation2 + $0x6a0] sm:$0xff] %vm704_vm0, %v660_v15  ;;  %v661_v19 = vld [vmem:[%s2603_s29 + $0x6a8] sm:$0xff]  ;;  %919 = vst.msk [vmem:[#allocation2 + $0x6b0] sm:$0xff] %vm704_vm0, %v662_v23 }
  0xff   : > { %901 = vst.msk [vmem:[#allocation2 + $0x620] sm:$0xff] %vm704_vm0, %v644_v16  ;;  %v645_v20 = vld [vmem:[%s2603_s29 + $0x628] sm:$0xff]  ;;  %918 = vst.msk [vmem:[#allocation2 + $0x6a8] sm:$0xff] %vm704_vm0, %v661_v19  ;;  %v646_v24 = vld [vmem:[%s2603_s29 + $0x630] sm:$0xff] }
 0x100   : > { %1323 = vxpose.xlu1.b32.cont [11/16] (narrow) %v1019_v45, 8  ;;  %v1051_v45 = vld [vmem:[#allocation2 + $0x2d0] sm:$0xff]  ;;  %902 = vst.msk [vmem:[#allocation2 + $0x628] sm:$0xff] %vm704_vm0, %v645_v20  ;;  %903 = vst.msk [vmem:[#allocation2 + $0x630] sm:$0xff] %vm704_vm0, %v646_v24  ;;  %v663_v27 = vld [vmem:[%s2603_s29 + $0x6b8] sm:$0xff] }
 0x101   : > { %1291 = vxpose.xlu0.b32.cont [11/16] (narrow) %v1003_v46, 8  ;;  %v1035_v46 = vld [vmem:[#allocation2 + $0x250] sm:$0xff]  ;;  %920 = vst.msk [vmem:[#allocation2 + $0x6b8] sm:$0xff] %vm704_vm0, %v663_v27  ;;  %v647_v28 = vld [vmem:[%s2603_s29 + $0x638] sm:$0xff]  ;;  %v664_v31 = vld [vmem:[%s2603_s29 + $0x6c0] sm:$0xff] }
 0x102   : > { %904 = vst.msk [vmem:[#allocation2 + $0x638] sm:$0xff] %vm704_vm0, %v647_v28  ;;  %v648_v32 = vld [vmem:[%s2603_s29 + $0x640] sm:$0xff]  ;;  %921 = vst.msk [vmem:[#allocation2 + $0x6c0] sm:$0xff] %vm704_vm0, %v664_v31  ;;  %v665_v35 = vld [vmem:[%s2603_s29 + $0x6c8] sm:$0xff] }
 0x103   : > { %905 = vst.msk [vmem:[#allocation2 + $0x640] sm:$0xff] %vm704_vm0, %v648_v32  ;;  %v649_v36 = vld [vmem:[%s2603_s29 + $0x648] sm:$0xff]  ;;  %922 = vst.msk [vmem:[#allocation2 + $0x6c8] sm:$0xff] %vm704_vm0, %v665_v35  ;;  %v666_v39 = vld [vmem:[%s2603_s29 + $0x6d0] sm:$0xff] }
 0x104   : > { %1324 = vxpose.xlu1.b32.cont [12/16] (narrow) %v1020_v49, 8  ;;  %v1052_v49 = vld [vmem:[#allocation2 + $0x2d8] sm:$0xff]  ;;  %906 = vst.msk [vmem:[#allocation2 + $0x648] sm:$0xff] %vm704_vm0, %v649_v36  ;;  %923 = vst.msk [vmem:[#allocation2 + $0x6d0] sm:$0xff] %vm704_vm0, %v666_v39  ;;  %v650_v40 = vld [vmem:[%s2603_s29 + $0x650] sm:$0xff] }
 0x105   : > { %1292 = vxpose.xlu0.b32.cont [12/16] (narrow) %v1004_v50, 8  ;;  %v1036_v50 = vld [vmem:[#allocation2 + $0x258] sm:$0xff]  ;;  %907 = vst.msk [vmem:[#allocation2 + $0x650] sm:$0xff] %vm704_vm0, %v650_v40  ;;  %v668_v47 = vld [vmem:[%s2603_s29 + $0x6e0] sm:$0xff]  ;;  %v669_v51 = vld [vmem:[%s2603_s29 + $0x6e8] sm:$0xff] }
 0x106   : > { %v667_v43 = vld [vmem:[%s2603_s29 + $0x6d8] sm:$0xff]  ;;  %v652_v48 = vld [vmem:[%s2603_s29 + $0x660] sm:$0xff]  ;;  %925 = vst.msk [vmem:[#allocation2 + $0x6e0] sm:$0xff] %vm704_vm0, %v668_v47  ;;  %v653_v52 = vld [vmem:[%s2603_s29 + $0x668] sm:$0xff] }
 0x107   : > { %924 = vst.msk [vmem:[#allocation2 + $0x6d8] sm:$0xff] %vm704_vm0, %v667_v43  ;;  %v651_v44 = vld [vmem:[%s2603_s29 + $0x658] sm:$0xff]  ;;  %909 = vst.msk [vmem:[#allocation2 + $0x660] sm:$0xff] %vm704_vm0, %v652_v48  ;;  %v670_v55 = vld [vmem:[%s2603_s29 + $0x6f0] sm:$0xff] }
 0x108   : > { %1325 = vxpose.xlu1.b32.cont [13/16] (narrow) %v1021_v53, 8  ;;  %v1053_v53 = vld [vmem:[#allocation2 + $0x2e0] sm:$0xff]  ;;  %908 = vst.msk [vmem:[#allocation2 + $0x658] sm:$0xff] %vm704_vm0, %v651_v44  ;;  %926 = vst.msk [vmem:[#allocation2 + $0x6e8] sm:$0xff] %vm704_vm0, %v669_v51  ;;  %v654_v56 = vld [vmem:[%s2603_s29 + $0x670] sm:$0xff] }
 0x109   : > { %1293 = vxpose.xlu0.b32.cont [13/16] (narrow) %v1005_v54, 8  ;;  %v1037_v54 = vld [vmem:[#allocation2 + $0x260] sm:$0xff]  ;;  %910 = vst.msk [vmem:[#allocation2 + $0x668] sm:$0xff] %vm704_vm0, %v653_v52  ;;  %927 = vst.msk [vmem:[#allocation2 + $0x6f0] sm:$0xff] %vm704_vm0, %v670_v55  ;;  %v671_v59 = vld [vmem:[%s2603_s29 + $0x6f8] sm:$0xff] }
 0x10a   : > { %911 = vst.msk [vmem:[#allocation2 + $0x670] sm:$0xff] %vm704_vm0, %v654_v56  ;;  %928 = vst.msk [vmem:[#allocation2 + $0x6f8] sm:$0xff] %vm704_vm0, %v671_v59  ;;  %v655_v60 = vld [vmem:[%s2603_s29 + $0x678] sm:$0xff]  ;;  %v688_v63 = vld [vmem:[%s2603_s29 + $0x780] sm:$0xff] }
 0x10b   : > { %912 = vst.msk [vmem:[#allocation2 + $0x678] sm:$0xff] %vm704_vm0, %v655_v60  ;;  %v672_v0 = vld [vmem:[%s2603_s29 + $0x700] sm:$0xff]  ;;  %945 = vst.msk [vmem:[#allocation2 + $0x780] sm:$0xff] %vm704_vm0, %v688_v63  ;;  %v689_v3 = vld [vmem:[%s2603_s29 + $0x788] sm:$0xff] }
 0x10c   : > { %1326 = vxpose.xlu1.b32.cont [14/16] (narrow) %v1022_v57, 8  ;;  %v1054_v57 = vld [vmem:[#allocation2 + $0x2e8] sm:$0xff]  ;;  %929 = vst.msk [vmem:[#allocation2 + $0x700] sm:$0xff] %vm704_vm0, %v672_v0  ;;  %946 = vst.msk [vmem:[#allocation2 + $0x788] sm:$0xff] %vm704_vm0, %v689_v3  ;;  %v690_v7 = vld [vmem:[%s2603_s29 + $0x790] sm:$0xff] }
 0x10d   : > { %1294 = vxpose.xlu0.b32.cont [14/16] (narrow) %v1006_v58, 8  ;;  %v1038_v58 = vld [vmem:[#allocation2 + $0x268] sm:$0xff]  ;;  %947 = vst.msk [vmem:[#allocation2 + $0x790] sm:$0xff] %vm704_vm0, %v690_v7  ;;  %v674_v8 = vld [vmem:[%s2603_s29 + $0x710] sm:$0xff]  ;;  %v691_v11 = vld [vmem:[%s2603_s29 + $0x798] sm:$0xff] }
 0x10e   : > { %v673_v4 = vld [vmem:[%s2603_s29 + $0x708] sm:$0xff]  ;;  %931 = vst.msk [vmem:[#allocation2 + $0x710] sm:$0xff] %vm704_vm0, %v674_v8  ;;  %948 = vst.msk [vmem:[#allocation2 + $0x798] sm:$0xff] %vm704_vm0, %v691_v11  ;;  %v675_v12 = vld [vmem:[%s2603_s29 + $0x718] sm:$0xff] }
 0x10f   : > { %930 = vst.msk [vmem:[#allocation2 + $0x708] sm:$0xff] %vm704_vm0, %v673_v4  ;;  %932 = vst.msk [vmem:[#allocation2 + $0x718] sm:$0xff] %vm704_vm0, %v675_v12  ;;  %v692_v15 = vld [vmem:[%s2603_s29 + $0x7a0] sm:$0xff]  ;;  %v693_v19 = vld [vmem:[%s2603_s29 + $0x7a8] sm:$0xff] }
 0x110   : > { %1327 = vxpose.xlu1.b32.cont [15/16] (narrow) %v1023_v61, 8  ;;  %v1055_v61 = vld [vmem:[#allocation2 + $0x2f0] sm:$0xff]  ;;  %v676_v16 = vld [vmem:[%s2603_s29 + $0x720] sm:$0xff]  ;;  %949 = vst.msk [vmem:[#allocation2 + $0x7a0] sm:$0xff] %vm704_vm0, %v692_v15  ;;  %v677_v20 = vld [vmem:[%s2603_s29 + $0x728] sm:$0xff] }
 0x111   : > { %1295 = vxpose.xlu0.b32.cont [15/16] (narrow) %v1007_v62, 8  ;;  %v1039_v62 = vld [vmem:[#allocation2 + $0x270] sm:$0xff]  ;;  %933 = vst.msk [vmem:[#allocation2 + $0x720] sm:$0xff] %vm704_vm0, %v676_v16  ;;  %950 = vst.msk [vmem:[#allocation2 + $0x7a8] sm:$0xff] %vm704_vm0, %v693_v19  ;;  %v695_v27 = vld [vmem:[%s2603_s29 + $0x7b8] sm:$0xff]  ;;  %v1752_v19 = vlaneseq }
 0x112   : > { %934 = vst.msk [vmem:[#allocation2 + $0x728] sm:$0xff] %vm704_vm0, %v677_v20  ;;  %v694_v23 = vld [vmem:[%s2603_s29 + $0x7b0] sm:$0xff]  ;;  %952 = vst.msk [vmem:[#allocation2 + $0x7b8] sm:$0xff] %vm704_vm0, %v695_v27  ;;  %v679_v28 = vld [vmem:[%s2603_s29 + $0x738] sm:$0xff] }
 0x113   : > { %951 = vst.msk [vmem:[#allocation2 + $0x7b0] sm:$0xff] %vm704_vm0, %v694_v23  ;;  %v678_v24 = vld [vmem:[%s2603_s29 + $0x730] sm:$0xff]  ;;  %936 = vst.msk [vmem:[#allocation2 + $0x738] sm:$0xff] %vm704_vm0, %v679_v28  ;;  %v696_v31 = vld [vmem:[%s2603_s29 + $0x7c0] sm:$0xff] }
 0x114   : > { %1328 = vxpose.xlu1.b32.end [16/16] (narrow) %v1024_v1, 8  ;;  %v1056_v1 = vld [vmem:[#allocation2 + $0x2f8] sm:$0xff]  ;;  %935 = vst.msk [vmem:[#allocation2 + $0x730] sm:$0xff] %vm704_vm0, %v678_v24  ;;  %v680_v32 = vld [vmem:[%s2603_s29 + $0x740] sm:$0xff]  ;;  %953 = vst.msk [vmem:[#allocation2 + $0x7c0] sm:$0xff] %vm704_vm0, %v696_v31 }
 0x115   : > { %1296 = vxpose.xlu0.b32.end [16/16] (narrow) %v1008_v2, 8  ;;  %v1040_v2 = vld [vmem:[#allocation2 + $0x278] sm:$0xff]  ;;  %937 = vst.msk [vmem:[#allocation2 + $0x740] sm:$0xff] %vm704_vm0, %v680_v32  ;;  %v697_v35 = vld [vmem:[%s2603_s29 + $0x7c8] sm:$0xff]  ;;  %v698_v39 = vld [vmem:[%s2603_s29 + $0x7d0] sm:$0xff] }
 0x116   : > { %v681_v36 = vld [vmem:[%s2603_s29 + $0x748] sm:$0xff]  ;;  %954 = vst.msk [vmem:[#allocation2 + $0x7c8] sm:$0xff] %vm704_vm0, %v697_v35  ;;  %955 = vst.msk [vmem:[#allocation2 + $0x7d0] sm:$0xff] %vm704_vm0, %v698_v39  ;;  %v682_v40 = vld [vmem:[%s2603_s29 + $0x750] sm:$0xff] }
 0x117   : > { %938 = vst.msk [vmem:[#allocation2 + $0x748] sm:$0xff] %vm704_vm0, %v681_v36  ;;  %939 = vst.msk [vmem:[#allocation2 + $0x750] sm:$0xff] %vm704_vm0, %v682_v40  ;;  %v699_v43 = vld [vmem:[%s2603_s29 + $0x7d8] sm:$0xff]  ;;  %v700_v47 = vld [vmem:[%s2603_s29 + $0x7e0] sm:$0xff] }
 0x118   : > { %1377 = vxpose.xlu1.b32.start [1/16] (narrow) %v1041_v5, 8  ;;  %v1073_v5 = vld [vmem:[#allocation2 + $0x380] sm:$0xff]  ;;  %956 = vst.msk [vmem:[#allocation2 + $0x7d8] sm:$0xff] %vm704_vm0, %v699_v43  ;;  %v683_v44 = vld [vmem:[%s2603_s29 + $0x758] sm:$0xff]  ;;  %957 = vst.msk [vmem:[#allocation2 + $0x7e0] sm:$0xff] %vm704_vm0, %v700_v47  ;;  %v1265_v7 = vpop.trf.xlu1 }
 0x119   : > { %1345 = vxpose.xlu0.b32.start [1/16] (narrow) %v1025_v6, 8  ;;  %v1057_v6 = vld [vmem:[#allocation2 + $0x300] sm:$0xff]  ;;  %940 = vst.msk [vmem:[#allocation2 + $0x758] sm:$0xff] %vm704_vm0, %v683_v44  ;;  %v701_v51 = vld [vmem:[%s2603_s29 + $0x7e8] sm:$0xff]  ;;  %v702_v55 = vld [vmem:[%s2603_s29 + $0x7f0] sm:$0xff]  ;;  %v1233_v8 = vpop.trf.xlu0 }
 0x11a   : > { %v684_v48 = vld [vmem:[%s2603_s29 + $0x760] sm:$0xff]  ;;  %v685_v52 = vld [vmem:[%s2603_s29 + $0x768] sm:$0xff]  ;;  %958 = vst.msk [vmem:[#allocation2 + $0x7e8] sm:$0xff] %vm704_vm0, %v701_v51  ;;  %959 = vst.msk [vmem:[#allocation2 + $0x7f0] sm:$0xff] %vm704_vm0, %v702_v55  ;;  %v1745_v31 = vcombine.low %v1233_v8, %v1265_v7 }
 0x11b   : > { %941 = vst.msk [vmem:[#allocation2 + $0x760] sm:$0xff] %vm704_vm0, %v684_v48  ;;  %942 = vst.msk [vmem:[#allocation2 + $0x768] sm:$0xff] %vm704_vm0, %v685_v52  ;;  %v686_v56 = vld [vmem:[%s2603_s29 + $0x770] sm:$0xff]  ;;  %v703_v59 = vld [vmem:[%s2603_s29 + $0x7f8] sm:$0xff] }
 0x11c   : > { %1378 = vxpose.xlu1.b32.cont [2/16] (narrow) %v1042_v9, 8  ;;  %v1074_v9 = vld [vmem:[#allocation2 + $0x388] sm:$0xff]  ;;  %943 = vst.msk [vmem:[#allocation2 + $0x770] sm:$0xff] %vm704_vm0, %v686_v56  ;;  %960 = vst.msk [vmem:[#allocation2 + $0x7f8] sm:$0xff] %vm704_vm0, %v703_v59  ;;  %v687_v60 = vld [vmem:[%s2603_s29 + $0x778] sm:$0xff] }
 0x11d   : > { %1346 = vxpose.xlu0.b32.cont [2/16] (narrow) %v1026_v10, 8  ;;  %v1058_v10 = vld [vmem:[#allocation2 + $0x308] sm:$0xff]  ;;  %944 = vst.msk [vmem:[#allocation2 + $0x778] sm:$0xff] %vm704_vm0, %v687_v60  ;;  %v1152_v63 = vld [vmem:[#allocation2 + $0x5f8] sm:$0xff]  ;;  %v1173_v11 = vld [vmem:[#allocation2 + $0x6a0] sm:$0xff] }
 0x11e   : > { %v1136_v0 = vld [vmem:[#allocation2 + $0x578] sm:$0xff]  ;;  %v1170_v3 = vld [vmem:[#allocation2 + $0x688] sm:$0xff]  ;;  %v1157_v12 = vld [vmem:[#allocation2 + $0x620] sm:$0xff] }
 0x11f   : > { %v1154_v4 = vld [vmem:[#allocation2 + $0x608] sm:$0xff]  ;;  %v1159_v23 = vld [vmem:[#allocation2 + $0x630] sm:$0xff]  ;;  %v1160_v27 = vld [vmem:[#allocation2 + $0x638] sm:$0xff] }
 0x120   : > { %1379 = vxpose.xlu1.b32.cont [3/16] (narrow) %v1043_v13, 8  ;;  %v1075_v13 = vld [vmem:[#allocation2 + $0x390] sm:$0xff]  ;;  %v1174_v15 = vld [vmem:[#allocation2 + $0x6a8] sm:$0xff]  ;;  %v1177_v35 = vld [vmem:[#allocation2 + $0x6c0] sm:$0xff] }
 0x121   : > { %1347 = vxpose.xlu0.b32.cont [3/16] (narrow) %v1027_v14, 8  ;;  %v1059_v14 = vld [vmem:[#allocation2 + $0x310] sm:$0xff]  ;;  %v1158_v16 = vld [vmem:[#allocation2 + $0x628] sm:$0xff]  ;;  %v1161_v36 = vld [vmem:[#allocation2 + $0x640] sm:$0xff] }
 0x122   : > { %v1180_v51 = vld [vmem:[#allocation2 + $0x6d8] sm:$0xff]  ;;  %v1181_v56 = vld [vmem:[#allocation2 + $0x6e0] sm:$0xff]  ;;  %v1182_v60 = vld [vmem:[#allocation2 + $0x6e8] sm:$0xff] }
 0x123   : > { %v1164_v52 = vld [vmem:[#allocation2 + $0x658] sm:$0xff]  ;;  %v1187_v7 = vld [vmem:[#allocation2 + $0x710] sm:$0xff] }
 0x124   : > { %1380 = vxpose.xlu1.b32.cont [4/16] (narrow) %v1044_v17, 8  ;;  %v1076_v17 = vld [vmem:[#allocation2 + $0x398] sm:$0xff] }
 0x125   : > { %1348 = vxpose.xlu0.b32.cont [4/16] (narrow) %v1028_v18, 8  ;;  %v1060_v18 = vld [vmem:[#allocation2 + $0x318] sm:$0xff] }
 0x126   : > { %v1204_v8 = vld [vmem:[#allocation2 + $0x798] sm:$0xff] }
 0x128   : > { %1381 = vxpose.xlu1.b32.cont [5/16] (narrow) %v1045_v21, 8  ;;  %v1077_v21 = vld [vmem:[#allocation2 + $0x3a0] sm:$0xff] }
 0x129   : > { %1349 = vxpose.xlu0.b32.cont [5/16] (narrow) %v1029_v22, 8  ;;  %v1061_v22 = vld [vmem:[#allocation2 + $0x320] sm:$0xff] }
 0x12c   : > { %1382 = vxpose.xlu1.b32.cont [6/16] (narrow) %v1046_v25, 8  ;;  %v1078_v25 = vld [vmem:[#allocation2 + $0x3a8] sm:$0xff] }
 0x12d   : > { %1350 = vxpose.xlu0.b32.cont [6/16] (narrow) %v1030_v26, 8  ;;  %v1062_v26 = vld [vmem:[#allocation2 + $0x328] sm:$0xff] }
 0x130   : > { %1383 = vxpose.xlu1.b32.cont [7/16] (narrow) %v1047_v29, 8  ;;  %v1079_v29 = vld [vmem:[#allocation2 + $0x3b0] sm:$0xff] }
 0x131   : > { %1351 = vxpose.xlu0.b32.cont [7/16] (narrow) %v1031_v30, 8  ;;  %v1063_v30 = vld [vmem:[#allocation2 + $0x330] sm:$0xff] }
 0x134   : > { %1384 = vxpose.xlu1.b32.cont [8/16] (narrow) %v1048_v33, 8  ;;  %v1080_v33 = vld [vmem:[#allocation2 + $0x3b8] sm:$0xff] }
 0x135   : > { %1352 = vxpose.xlu0.b32.cont [8/16] (narrow) %v1032_v34, 8  ;;  %v1064_v34 = vld [vmem:[#allocation2 + $0x338] sm:$0xff] }
 0x138   : > { %1385 = vxpose.xlu1.b32.cont [9/16] (narrow) %v1049_v37, 8  ;;  %v1081_v37 = vld [vmem:[#allocation2 + $0x3c0] sm:$0xff] }
 0x139   : > { %1353 = vxpose.xlu0.b32.cont [9/16] (narrow) %v1033_v38, 8  ;;  %v1065_v38 = vld [vmem:[#allocation2 + $0x340] sm:$0xff] }
 0x13c   : > { %1386 = vxpose.xlu1.b32.cont [10/16] (narrow) %v1050_v41, 8  ;;  %v1082_v41 = vld [vmem:[#allocation2 + $0x3c8] sm:$0xff] }
 0x13d   : > { %1354 = vxpose.xlu0.b32.cont [10/16] (narrow) %v1034_v42, 8  ;;  %v1066_v42 = vld [vmem:[#allocation2 + $0x348] sm:$0xff] }
 0x140   : > { %1387 = vxpose.xlu1.b32.cont [11/16] (narrow) %v1051_v45, 8  ;;  %v1083_v45 = vld [vmem:[#allocation2 + $0x3d0] sm:$0xff] }
 0x141   : > { %1355 = vxpose.xlu0.b32.cont [11/16] (narrow) %v1035_v46, 8  ;;  %v1067_v46 = vld [vmem:[#allocation2 + $0x350] sm:$0xff] }
 0x144   : > { %1388 = vxpose.xlu1.b32.cont [12/16] (narrow) %v1052_v49, 8  ;;  %v1084_v49 = vld [vmem:[#allocation2 + $0x3d8] sm:$0xff] }
 0x145   : > { %1356 = vxpose.xlu0.b32.cont [12/16] (narrow) %v1036_v50, 8  ;;  %v1068_v50 = vld [vmem:[#allocation2 + $0x358] sm:$0xff] }
 0x148   : > { %1389 = vxpose.xlu1.b32.cont [13/16] (narrow) %v1053_v53, 8  ;;  %v1085_v53 = vld [vmem:[#allocation2 + $0x3e0] sm:$0xff] }
 0x149   : > { %1357 = vxpose.xlu0.b32.cont [13/16] (narrow) %v1037_v54, 8  ;;  %v1069_v54 = vld [vmem:[#allocation2 + $0x360] sm:$0xff] }
 0x14c   : > { %1390 = vxpose.xlu1.b32.cont [14/16] (narrow) %v1054_v57, 8  ;;  %v1086_v57 = vld [vmem:[#allocation2 + $0x3e8] sm:$0xff] }
 0x14d   : > { %1358 = vxpose.xlu0.b32.cont [14/16] (narrow) %v1038_v58, 8  ;;  %v1070_v58 = vld [vmem:[#allocation2 + $0x368] sm:$0xff] }
 0x150   : > { %1391 = vxpose.xlu1.b32.cont [15/16] (narrow) %v1055_v61, 8  ;;  %v1087_v61 = vld [vmem:[#allocation2 + $0x3f0] sm:$0xff] }
 0x151   : > { %1359 = vxpose.xlu0.b32.cont [15/16] (narrow) %v1039_v62, 8  ;;  %v1071_v62 = vld [vmem:[#allocation2 + $0x370] sm:$0xff] }
 0x154   : > { %1392 = vxpose.xlu1.b32.end [16/16] (narrow) %v1056_v1, 8  ;;  %v1088_v1 = vld [vmem:[#allocation2 + $0x3f8] sm:$0xff] }
 0x155   : > { %1360 = vxpose.xlu0.b32.end [16/16] (narrow) %v1040_v2, 8  ;;  %v1072_v2 = vld [vmem:[#allocation2 + $0x378] sm:$0xff] }
 0x158   : > { %1441 = vxpose.xlu1.b32.start [1/16] (narrow) %v1073_v5, 8  ;;  %v1105_v5 = vld [vmem:[#allocation2 + $0x480] sm:$0xff] }
 0x159   : > { %1409 = vxpose.xlu0.b32.start [1/16] (narrow) %v1057_v6, 8  ;;  %v1089_v6 = vld [vmem:[#allocation2 + $0x400] sm:$0xff] }
 0x15c   : > { %1442 = vxpose.xlu1.b32.cont [2/16] (narrow) %v1074_v9, 8  ;;  %v1106_v9 = vld [vmem:[#allocation2 + $0x488] sm:$0xff] }
 0x15d   : > { %1410 = vxpose.xlu0.b32.cont [2/16] (narrow) %v1058_v10, 8  ;;  %v1090_v10 = vld [vmem:[#allocation2 + $0x408] sm:$0xff] }
 0x160   : > { %1443 = vxpose.xlu1.b32.cont [3/16] (narrow) %v1075_v13, 8  ;;  %v1107_v13 = vld [vmem:[#allocation2 + $0x490] sm:$0xff] }
 0x161   : > { %1411 = vxpose.xlu0.b32.cont [3/16] (narrow) %v1059_v14, 8  ;;  %v1091_v14 = vld [vmem:[#allocation2 + $0x410] sm:$0xff] }
 0x164   : > { %1444 = vxpose.xlu1.b32.cont [4/16] (narrow) %v1076_v17, 8  ;;  %v1108_v17 = vld [vmem:[#allocation2 + $0x498] sm:$0xff] }
 0x165   : > { %1412 = vxpose.xlu0.b32.cont [4/16] (narrow) %v1060_v18, 8  ;;  %v1092_v18 = vld [vmem:[#allocation2 + $0x418] sm:$0xff] }
 0x168   : > { %1445 = vxpose.xlu1.b32.cont [5/16] (narrow) %v1077_v21, 8  ;;  %v1109_v21 = vld [vmem:[#allocation2 + $0x4a0] sm:$0xff] }
 0x169   : > { %1413 = vxpose.xlu0.b32.cont [5/16] (narrow) %v1061_v22, 8  ;;  %v1093_v22 = vld [vmem:[#allocation2 + $0x420] sm:$0xff] }
 0x16c   : > { %1446 = vxpose.xlu1.b32.cont [6/16] (narrow) %v1078_v25, 8  ;;  %v1110_v25 = vld [vmem:[#allocation2 + $0x4a8] sm:$0xff] }
 0x16d   : > { %1414 = vxpose.xlu0.b32.cont [6/16] (narrow) %v1062_v26, 8  ;;  %v1094_v26 = vld [vmem:[#allocation2 + $0x428] sm:$0xff] }
 0x170   : > { %1447 = vxpose.xlu1.b32.cont [7/16] (narrow) %v1079_v29, 8  ;;  %v1111_v29 = vld [vmem:[#allocation2 + $0x4b0] sm:$0xff] }
 0x171   : > { %1415 = vxpose.xlu0.b32.cont [7/16] (narrow) %v1063_v30, 8  ;;  %v1095_v30 = vld [vmem:[#allocation2 + $0x430] sm:$0xff] }
 0x174   : > { %1448 = vxpose.xlu1.b32.cont [8/16] (narrow) %v1080_v33, 8  ;;  %v1112_v33 = vld [vmem:[#allocation2 + $0x4b8] sm:$0xff] }
 0x175   : > { %1416 = vxpose.xlu0.b32.cont [8/16] (narrow) %v1064_v34, 8  ;;  %v1096_v34 = vld [vmem:[#allocation2 + $0x438] sm:$0xff] }
 0x178   : > { %1449 = vxpose.xlu1.b32.cont [9/16] (narrow) %v1081_v37, 8  ;;  %v1113_v37 = vld [vmem:[#allocation2 + $0x4c0] sm:$0xff] }
 0x179   : > { %1417 = vxpose.xlu0.b32.cont [9/16] (narrow) %v1065_v38, 8  ;;  %v1097_v38 = vld [vmem:[#allocation2 + $0x440] sm:$0xff] }
 0x17c   : > { %1450 = vxpose.xlu1.b32.cont [10/16] (narrow) %v1082_v41, 8  ;;  %v1114_v41 = vld [vmem:[#allocation2 + $0x4c8] sm:$0xff] }
 0x17d   : > { %1418 = vxpose.xlu0.b32.cont [10/16] (narrow) %v1066_v42, 8  ;;  %v1098_v42 = vld [vmem:[#allocation2 + $0x448] sm:$0xff] }
 0x180   : > { %1451 = vxpose.xlu1.b32.cont [11/16] (narrow) %v1083_v45, 8  ;;  %v1115_v45 = vld [vmem:[#allocation2 + $0x4d0] sm:$0xff] }
 0x181   : > { %1419 = vxpose.xlu0.b32.cont [11/16] (narrow) %v1067_v46, 8  ;;  %v1099_v46 = vld [vmem:[#allocation2 + $0x450] sm:$0xff] }
 0x184   : > { %1452 = vxpose.xlu1.b32.cont [12/16] (narrow) %v1084_v49, 8  ;;  %v1116_v49 = vld [vmem:[#allocation2 + $0x4d8] sm:$0xff] }
 0x185   : > { %1420 = vxpose.xlu0.b32.cont [12/16] (narrow) %v1068_v50, 8  ;;  %v1100_v50 = vld [vmem:[#allocation2 + $0x458] sm:$0xff] }
 0x188   : > { %1453 = vxpose.xlu1.b32.cont [13/16] (narrow) %v1085_v53, 8  ;;  %v1117_v53 = vld [vmem:[#allocation2 + $0x4e0] sm:$0xff] }
 0x189   : > { %1421 = vxpose.xlu0.b32.cont [13/16] (narrow) %v1069_v54, 8  ;;  %v1101_v54 = vld [vmem:[#allocation2 + $0x460] sm:$0xff] }
 0x18c   : > { %1454 = vxpose.xlu1.b32.cont [14/16] (narrow) %v1086_v57, 8  ;;  %v1118_v57 = vld [vmem:[#allocation2 + $0x4e8] sm:$0xff] }
 0x18d   : > { %1422 = vxpose.xlu0.b32.cont [14/16] (narrow) %v1070_v58, 8  ;;  %v1102_v58 = vld [vmem:[#allocation2 + $0x468] sm:$0xff] }
 0x190   : > { %1455 = vxpose.xlu1.b32.cont [15/16] (narrow) %v1087_v61, 8  ;;  %v1119_v61 = vld [vmem:[#allocation2 + $0x4f0] sm:$0xff] }
 0x191   : > { %1423 = vxpose.xlu0.b32.cont [15/16] (narrow) %v1071_v62, 8  ;;  %v1103_v62 = vld [vmem:[#allocation2 + $0x470] sm:$0xff] }
 0x194   : > { %1456 = vxpose.xlu1.b32.end [16/16] (narrow) %v1088_v1, 8  ;;  %v1120_v1 = vld [vmem:[#allocation2 + $0x4f8] sm:$0xff] }
 0x195   : > { %1424 = vxpose.xlu0.b32.end [16/16] (narrow) %v1072_v2, 8  ;;  %v1104_v2 = vld [vmem:[#allocation2 + $0x478] sm:$0xff] }
 0x198   : > { %1505 = vxpose.xlu1.b32.start [1/16] (narrow) %v1105_v5, 8  ;;  %v1137_v5 = vld [vmem:[#allocation2 + $0x580] sm:$0xff] }
 0x199   : > { %1473 = vxpose.xlu0.b32.start [1/16] (narrow) %v1089_v6, 8  ;;  %v1121_v6 = vld [vmem:[#allocation2 + $0x500] sm:$0xff] }
 0x19c   : > { %1506 = vxpose.xlu1.b32.cont [2/16] (narrow) %v1106_v9, 8  ;;  %v1138_v9 = vld [vmem:[#allocation2 + $0x588] sm:$0xff] }
 0x19d   : > { %1474 = vxpose.xlu0.b32.cont [2/16] (narrow) %v1090_v10, 8  ;;  %v1122_v10 = vld [vmem:[#allocation2 + $0x508] sm:$0xff] }
 0x1a0   : > { %1507 = vxpose.xlu1.b32.cont [3/16] (narrow) %v1107_v13, 8  ;;  %v1139_v13 = vld [vmem:[#allocation2 + $0x590] sm:$0xff] }
 0x1a1   : > { %1475 = vxpose.xlu0.b32.cont [3/16] (narrow) %v1091_v14, 8  ;;  %v1123_v14 = vld [vmem:[#allocation2 + $0x510] sm:$0xff] }
 0x1a4   : > { %1508 = vxpose.xlu1.b32.cont [4/16] (narrow) %v1108_v17, 8  ;;  %v1140_v17 = vld [vmem:[#allocation2 + $0x598] sm:$0xff] }
 0x1a5   : > { %1476 = vxpose.xlu0.b32.cont [4/16] (narrow) %v1092_v18, 8  ;;  %v1124_v18 = vld [vmem:[#allocation2 + $0x518] sm:$0xff] }
 0x1a8   : > { %1509 = vxpose.xlu1.b32.cont [5/16] (narrow) %v1109_v21, 8  ;;  %v1141_v21 = vld [vmem:[#allocation2 + $0x5a0] sm:$0xff] }
 0x1a9   : > { %1477 = vxpose.xlu0.b32.cont [5/16] (narrow) %v1093_v22, 8  ;;  %v1125_v22 = vld [vmem:[#allocation2 + $0x520] sm:$0xff] }
 0x1ac   : > { %1510 = vxpose.xlu1.b32.cont [6/16] (narrow) %v1110_v25, 8  ;;  %v1142_v25 = vld [vmem:[#allocation2 + $0x5a8] sm:$0xff] }
 0x1ad   : > { %1478 = vxpose.xlu0.b32.cont [6/16] (narrow) %v1094_v26, 8  ;;  %v1126_v26 = vld [vmem:[#allocation2 + $0x528] sm:$0xff] }
 0x1b0   : > { %1511 = vxpose.xlu1.b32.cont [7/16] (narrow) %v1111_v29, 8  ;;  %v1143_v29 = vld [vmem:[#allocation2 + $0x5b0] sm:$0xff] }
 0x1b1   : > { %1479 = vxpose.xlu0.b32.cont [7/16] (narrow) %v1095_v30, 8  ;;  %v1127_v30 = vld [vmem:[#allocation2 + $0x530] sm:$0xff] }
 0x1b4   : > { %1512 = vxpose.xlu1.b32.cont [8/16] (narrow) %v1112_v33, 8  ;;  %v1144_v33 = vld [vmem:[#allocation2 + $0x5b8] sm:$0xff] }
 0x1b5   : > { %1480 = vxpose.xlu0.b32.cont [8/16] (narrow) %v1096_v34, 8  ;;  %v1128_v34 = vld [vmem:[#allocation2 + $0x538] sm:$0xff] }
 0x1b8   : > { %1513 = vxpose.xlu1.b32.cont [9/16] (narrow) %v1113_v37, 8  ;;  %v1145_v37 = vld [vmem:[#allocation2 + $0x5c0] sm:$0xff] }
 0x1b9   : > { %1481 = vxpose.xlu0.b32.cont [9/16] (narrow) %v1097_v38, 8  ;;  %v1129_v38 = vld [vmem:[#allocation2 + $0x540] sm:$0xff] }
 0x1bc   : > { %1514 = vxpose.xlu1.b32.cont [10/16] (narrow) %v1114_v41, 8  ;;  %v1146_v41 = vld [vmem:[#allocation2 + $0x5c8] sm:$0xff] }
 0x1bd   : > { %1482 = vxpose.xlu0.b32.cont [10/16] (narrow) %v1098_v42, 8  ;;  %v1130_v42 = vld [vmem:[#allocation2 + $0x548] sm:$0xff] }
 0x1c0   : > { %1515 = vxpose.xlu1.b32.cont [11/16] (narrow) %v1115_v45, 8  ;;  %v1147_v45 = vld [vmem:[#allocation2 + $0x5d0] sm:$0xff] }
 0x1c1   : > { %1483 = vxpose.xlu0.b32.cont [11/16] (narrow) %v1099_v46, 8  ;;  %v1131_v46 = vld [vmem:[#allocation2 + $0x550] sm:$0xff] }
 0x1c4   : > { %1516 = vxpose.xlu1.b32.cont [12/16] (narrow) %v1116_v49, 8  ;;  %v1148_v49 = vld [vmem:[#allocation2 + $0x5d8] sm:$0xff] }
 0x1c5   : > { %1484 = vxpose.xlu0.b32.cont [12/16] (narrow) %v1100_v50, 8  ;;  %v1132_v50 = vld [vmem:[#allocation2 + $0x558] sm:$0xff] }
 0x1c8   : > { %1517 = vxpose.xlu1.b32.cont [13/16] (narrow) %v1117_v53, 8  ;;  %v1149_v53 = vld [vmem:[#allocation2 + $0x5e0] sm:$0xff] }
 0x1c9   : > { %1485 = vxpose.xlu0.b32.cont [13/16] (narrow) %v1101_v54, 8  ;;  %v1133_v54 = vld [vmem:[#allocation2 + $0x560] sm:$0xff] }
 0x1cc   : > { %1518 = vxpose.xlu1.b32.cont [14/16] (narrow) %v1118_v57, 8  ;;  %v1150_v57 = vld [vmem:[#allocation2 + $0x5e8] sm:$0xff] }
 0x1cd   : > { %1486 = vxpose.xlu0.b32.cont [14/16] (narrow) %v1102_v58, 8  ;;  %v1134_v58 = vld [vmem:[#allocation2 + $0x568] sm:$0xff] }
 0x1d0   : > { %1519 = vxpose.xlu1.b32.cont [15/16] (narrow) %v1119_v61, 8  ;;  %v1151_v61 = vld [vmem:[#allocation2 + $0x5f0] sm:$0xff] }
 0x1d1   : > { %1487 = vxpose.xlu0.b32.cont [15/16] (narrow) %v1103_v62, 8  ;;  %v1135_v62 = vld [vmem:[#allocation2 + $0x570] sm:$0xff] }
 0x1d4   : > { %1520 = vxpose.xlu1.b32.end [16/16] (narrow) %v1120_v1, 8  ;;  %v1169_v1 = vld [vmem:[#allocation2 + $0x680] sm:$0xff] }
 0x1d5   : > { %1488 = vxpose.xlu0.b32.end [16/16] (narrow) %v1104_v2, 8  ;;  %v1153_v2 = vld [vmem:[#allocation2 + $0x600] sm:$0xff] }
 0x1d8   : > { %1569 = vxpose.xlu1.b32.start [1/16] (narrow) %v1137_v5, 8  ;;  %v1171_v5 = vld [vmem:[#allocation2 + $0x690] sm:$0xff] }
 0x1d9   : > { %1537 = vxpose.xlu0.b32.start [1/16] (narrow) %v1121_v6, 8  ;;  %v1155_v6 = vld [vmem:[#allocation2 + $0x610] sm:$0xff] }
 0x1dc   : > { %1570 = vxpose.xlu1.b32.cont [2/16] (narrow) %v1138_v9, 8  ;;  %v1172_v9 = vld [vmem:[#allocation2 + $0x698] sm:$0xff] }
 0x1dd   : > { %1538 = vxpose.xlu0.b32.cont [2/16] (narrow) %v1122_v10, 8  ;;  %v1156_v10 = vld [vmem:[#allocation2 + $0x618] sm:$0xff] }
 0x1e0   : > { %1571 = vxpose.xlu1.b32.cont [3/16] (narrow) %v1139_v13, 8  ;;  %v1329_v13 = vpop.trf.xlu1 }
 0x1e1   : > { %1539 = vxpose.xlu0.b32.cont [3/16] (narrow) %v1123_v14, 8  ;;  %v1297_v14 = vpop.trf.xlu0 }
 0x1e2   : > { %v1746_v32 = vcombine.low %v1297_v14, %v1329_v13  ;;  %v1190_v13 = vld [vmem:[#allocation2 + $0x728] sm:$0xff]  ;;  %v1207_v14 = vld [vmem:[#allocation2 + $0x7b0] sm:$0xff] }
 0x1e4   : > { %1572 = vxpose.xlu1.b32.cont [4/16] (narrow) %v1140_v17, 8  ;;  %v2263_v17 = vmov 1966171168   ;;  %v1393_v20 = vpop.trf.xlu1 }
 0x1e5   : > { %1540 = vxpose.xlu0.b32.cont [4/16] (narrow) %v1124_v18, 8  ;;  %v1750_v18 = vunpack.c.l.s4 %v2263_v17  ;;  %v1192_v17 = vld [vmem:[#allocation2 + $0x738] sm:$0xff] }
 0x1e7   : > { %v1751_v24 = vunpack.c.0.s8 %v1750_v18  ;;  %v1209_v18 = vld [vmem:[#allocation2 + $0x7c0] sm:$0xff] }
 0x1e8   : > { %1573 = vxpose.xlu1.b32.cont [5/16] (narrow) %v1141_v21, 8  ;;  %v1361_v21 = vpop.trf.xlu0  ;;  %v1457_v28 = vpop.trf.xlu1 }
 0x1e9   : > { %1541 = vxpose.xlu0.b32.cont [5/16] (narrow) %v1125_v22, 8  ;;  %v1175_v22 = vld [vmem:[#allocation2 + $0x6b0] sm:$0xff] }
 0x1ec   : > { %1574 = vxpose.xlu1.b32.cont [6/16] (narrow) %v1142_v25, 8  ;;  %v1753_v25 = vshrl.u32 %v1752_v19, 7  ;;  %v1193_v19 = vld [vmem:[#allocation2 + $0x740] sm:$0xff] }
 0x1ed   : > { %1542 = vxpose.xlu0.b32.cont [6/16] (narrow) %v1126_v26, 8  ;;  %v1176_v26 = vld [vmem:[#allocation2 + $0x6b8] sm:$0xff] }
 0x1f0   : > { %1575 = vxpose.xlu1.b32.cont [7/16] (narrow) %v1143_v29, 8  ;;  %v1425_v29 = vpop.trf.xlu0 }
 0x1f1   : > { %1543 = vxpose.xlu0.b32.cont [7/16] (narrow) %v1127_v30, 8  ;;  %v3117_v30 = vsub.s32 %v1751_v24, %v1753_v25  ;;  %v1212_v24 = vld [vmem:[#allocation2 + $0x7d8] sm:$0xff] }
 0x1f2   : > { %v1196_v25 = vld [vmem:[#allocation2 + $0x758] sm:$0xff] }
 0x1f4   : > { %1576 = vxpose.xlu1.b32.cont [8/16] (narrow) %v1144_v33, 8  ;;  %v1747_v33 = vcombine.low %v1361_v21, %v1393_v20  ;;  %v1210_v20 = vld [vmem:[#allocation2 + $0x7c8] sm:$0xff] }
 0x1f5   : > { %1544 = vxpose.xlu0.b32.cont [8/16] (narrow) %v1128_v34, 8  ;;  %v1748_v34 = vcombine.low %v1425_v29, %v1457_v28  ;;  %v1194_v21 = vld [vmem:[#allocation2 + $0x748] sm:$0xff] }
 0x1f6   : > { %v1769_v39 = vrot.slane %v1747_v33, %v3117_v30  ;;  %v1214_v28 = vld [vmem:[#allocation2 + $0x7e8] sm:$0xff]  ;;  %v1216_v33 = vld [vmem:[#allocation2 + $0x7f8] sm:$0xff] }
 0x1f7   : > { %v1776_v40 = vrot.slane %v1748_v34, %v3117_v30  ;;  %v1198_v29 = vld [vmem:[#allocation2 + $0x768] sm:$0xff]  ;;  %v1200_v34 = vld [vmem:[#allocation2 + $0x778] sm:$0xff] }
 0x1f8   : > { %1577 = vxpose.xlu1.b32.cont [9/16] (narrow) %v1145_v37, 8  ;;  %v1755_v37 = vrot.slane %v1745_v31, %v3117_v30  ;;  %v1215_v31 = vld [vmem:[#allocation2 + $0x7f0] sm:$0xff] }
 0x1f9   : > { %1545 = vxpose.xlu0.b32.cont [9/16] (narrow) %v1129_v38, 8  ;;  %v1762_v38 = vrot.slane %v1746_v32, %v3117_v30  ;;  %v1778_v44 = vcombine.low %v1769_v39, %v1776_v40  ;;  %v1848_v48 = vcombine.high %v1769_v39, %v1776_v40  ;;  %v1199_v32 = vld [vmem:[#allocation2 + $0x770] sm:$0xff] }
 0x1fb   : > { %v1777_v43 = vcombine.low %v1755_v37, %v1762_v38  ;;  %v1847_v47 = vcombine.high %v1755_v37, %v1762_v38 }
 0x1fc   : > { %1578 = vxpose.xlu1.b32.cont [10/16] (narrow) %v1146_v41, 8  ;;  %v1178_v41 = vld [vmem:[#allocation2 + $0x6c8] sm:$0xff] }
 0x1fd   : > { %1546 = vxpose.xlu0.b32.cont [10/16] (narrow) %v1130_v42, 8  ;;  %v1162_v42 = vld [vmem:[#allocation2 + $0x648] sm:$0xff] }
 0x200   : > { %1579 = vxpose.xlu1.b32.cont [11/16] (narrow) %v1147_v45, 8  ;;  %v1179_v45 = vld [vmem:[#allocation2 + $0x6d0] sm:$0xff] }
 0x201   : > { %1547 = vxpose.xlu0.b32.cont [11/16] (narrow) %v1131_v46, 8  ;;  %v1163_v46 = vld [vmem:[#allocation2 + $0x650] sm:$0xff] }
 0x204   : > { %1580 = vxpose.xlu1.b32.cont [12/16] (narrow) %v1148_v49, 8  ;;  %v1785_v49 = vrot.slane %v1777_v43, %v3117_v30 }
 0x205   : > { %1548 = vxpose.xlu0.b32.cont [12/16] (narrow) %v1132_v50, 8  ;;  %v1792_v50 = vrot.slane %v1778_v44, %v3117_v30 }
 0x207   : > { %v1885_v55 = vcombine.high %v1785_v49, %v1792_v50  ;;  %v1793_v59 = vcombine.low %v1785_v49, %v1792_v50 }
 0x208   : > { %1581 = vxpose.xlu1.b32.cont [13/16] (narrow) %v1149_v53, 8  ;;  %v1855_v53 = vrot.slane %v1847_v47, %v3117_v30 }
 0x209   : > { %1549 = vxpose.xlu0.b32.cont [13/16] (narrow) %v1133_v54, 8  ;;  %v1862_v54 = vrot.slane %v1848_v48, %v3117_v30  ;;  %1845 = vst [vmem:[%s3133_s6] sm:$0xff] %v1793_v59  ;;  %1889 = vst [vmem:[%s3136_s7] sm:$0xff] %v1885_v55 }
 0x20c   : > { %1582 = vxpose.xlu1.b32.cont [14/16] (narrow) %v1150_v57, 8  ;;  %v1165_v57 = vld [vmem:[#allocation2 + $0x660] sm:$0xff] }
 0x20d   : > { %1550 = vxpose.xlu0.b32.cont [14/16] (narrow) %v1134_v58, 8  ;;  %v1863_v58 = vcombine.low %v1855_v53, %v1862_v54 }
 0x20f   : > { %1883 = vst [vmem:[%s3130_s5] sm:$0xff] %v1863_v58 }
 0x210   : > { %1583 = vxpose.xlu1.b32.cont [15/16] (narrow) %v1151_v61, 8  ;;  %v1166_v61 = vld [vmem:[#allocation2 + $0x668] sm:$0xff] }
 0x211   : > { %1551 = vxpose.xlu0.b32.cont [15/16] (narrow) %v1135_v62, 8  ;;  %v1183_v62 = vld [vmem:[#allocation2 + $0x6f0] sm:$0xff] }
 0x214   : > { %1584 = vxpose.xlu1.b32.end [16/16] (narrow) %v1152_v63, 8  ;;  %v1167_v63 = vld [vmem:[#allocation2 + $0x670] sm:$0xff] }
 0x215   : > { %1552 = vxpose.xlu0.b32.end [16/16] (narrow) %v1136_v0, 8  ;;  %v1184_v0 = vld [vmem:[#allocation2 + $0x6f8] sm:$0xff] }
 0x218   : > { %1633 = vxpose.xlu1.b32.start [1/16] (narrow) %v1169_v1, 8  ;;  %v1168_v1 = vld [vmem:[#allocation2 + $0x678] sm:$0xff] }
 0x219   : > { %1601 = vxpose.xlu0.b32.start [1/16] (narrow) %v1153_v2, 8  ;;  %v1201_v2 = vld [vmem:[#allocation2 + $0x780] sm:$0xff] }
 0x21c   : > { %1634 = vxpose.xlu1.b32.cont [2/16] (narrow) %v1170_v3, 8  ;;  %v1185_v3 = vld [vmem:[#allocation2 + $0x700] sm:$0xff] }
 0x21d   : > { %1602 = vxpose.xlu0.b32.cont [2/16] (narrow) %v1154_v4, 8  ;;  %v1202_v4 = vld [vmem:[#allocation2 + $0x788] sm:$0xff] }
 0x220   : > { %1635 = vxpose.xlu1.b32.cont [3/16] (narrow) %v1171_v5, 8  ;;  %v1186_v5 = vld [vmem:[#allocation2 + $0x708] sm:$0xff] }
 0x221   : > { %1603 = vxpose.xlu0.b32.cont [3/16] (narrow) %v1155_v6, 8  ;;  %v1203_v6 = vld [vmem:[#allocation2 + $0x790] sm:$0xff] }
 0x224   : > { %1636 = vxpose.xlu1.b32.cont [4/16] (narrow) %v1172_v9, 8  ;;  %v1188_v9 = vld [vmem:[#allocation2 + $0x718] sm:$0xff] }
 0x225   : > { %1604 = vxpose.xlu0.b32.cont [4/16] (narrow) %v1156_v10, 8  ;;  %v1205_v10 = vld [vmem:[#allocation2 + $0x7a0] sm:$0xff] }
 0x228   : > { %1637 = vxpose.xlu1.b32.cont [5/16] (narrow) %v1173_v11, 8  ;;  %v1189_v11 = vld [vmem:[#allocation2 + $0x720] sm:$0xff] }
 0x229   : > { %1605 = vxpose.xlu0.b32.cont [5/16] (narrow) %v1157_v12, 8  ;;  %v1206_v12 = vld [vmem:[#allocation2 + $0x7a8] sm:$0xff] }
 0x22c   : > { %1638 = vxpose.xlu1.b32.cont [6/16] (narrow) %v1174_v15, 8  ;;  %v1191_v15 = vld [vmem:[#allocation2 + $0x730] sm:$0xff] }
 0x22d   : > { %1606 = vxpose.xlu0.b32.cont [6/16] (narrow) %v1158_v16, 8  ;;  %v1208_v16 = vld [vmem:[#allocation2 + $0x7b8] sm:$0xff] }
 0x230   : > { %1639 = vxpose.xlu1.b32.cont [7/16] (narrow) %v1175_v22, 8  ;;  %v1211_v22 = vld [vmem:[#allocation2 + $0x7d0] sm:$0xff] }
 0x231   : > { %1607 = vxpose.xlu0.b32.cont [7/16] (narrow) %v1159_v23, 8  ;;  %v1195_v23 = vld [vmem:[#allocation2 + $0x750] sm:$0xff] }
 0x234   : > { %1640 = vxpose.xlu1.b32.cont [8/16] (narrow) %v1176_v26, 8  ;;  %v1213_v26 = vld [vmem:[#allocation2 + $0x7e0] sm:$0xff] }
 0x235   : > { %1608 = vxpose.xlu0.b32.cont [8/16] (narrow) %v1160_v27, 8  ;;  %v1197_v27 = vld [vmem:[#allocation2 + $0x760] sm:$0xff] }
 0x238   : > { %1641 = vxpose.xlu1.b32.cont [9/16] (narrow) %v1177_v35, 8  ;;  %v1521_v35 = vpop.trf.xlu1 }
 0x239   : > { %1609 = vxpose.xlu0.b32.cont [9/16] (narrow) %v1161_v36, 8  ;;  %v1489_v36 = vpop.trf.xlu0 }
 0x23c   : > { %1642 = vxpose.xlu1.b32.cont [10/16] (narrow) %v1178_v41, 8  ;;  %v1794_v41 = vcombine.low %v1489_v36, %v1521_v35 }
 0x23d   : > { %1610 = vxpose.xlu0.b32.cont [10/16] (narrow) %v1162_v42, 8 }
 0x23e   : > { %v1804_v43 = vrot.slane %v1794_v41, %v3117_v30 }
 0x240   : > { %1643 = vxpose.xlu1.b32.cont [11/16] (narrow) %v1179_v45, 8 }
 0x241   : > { %1611 = vxpose.xlu0.b32.cont [11/16] (narrow) %v1163_v46, 8 }
 0x244   : > { %1644 = vxpose.xlu1.b32.cont [12/16] (narrow) %v1180_v51, 8 }
 0x245   : > { %1612 = vxpose.xlu0.b32.cont [12/16] (narrow) %v1164_v52, 8 }
 0x248   : > { %1645 = vxpose.xlu1.b32.cont [13/16] (narrow) %v1181_v56, 8 }
 0x249   : > { %1613 = vxpose.xlu0.b32.cont [13/16] (narrow) %v1165_v57, 8 }
 0x24c   : > { %1646 = vxpose.xlu1.b32.cont [14/16] (narrow) %v1182_v60, 8 }
 0x24d   : > { %1614 = vxpose.xlu0.b32.cont [14/16] (narrow) %v1166_v61, 8 }
 0x250   : > { %1647 = vxpose.xlu1.b32.cont [15/16] (narrow) %v1183_v62, 8 }
 0x251   : > { %1615 = vxpose.xlu0.b32.cont [15/16] (narrow) %v1167_v63, 8 }
 0x254   : > { %1648 = vxpose.xlu1.b32.end [16/16] (narrow) %v1184_v0, 8 }
 0x255   : > { %1616 = vxpose.xlu0.b32.end [16/16] (narrow) %v1168_v1, 8 }
 0x258   : > { %1697 = vxpose.xlu1.b32.start [1/16] (narrow) %v1201_v2, 8  ;;  %v1585_v37 = vpop.trf.xlu1 }
 0x259   : > { %1665 = vxpose.xlu0.b32.start [1/16] (narrow) %v1185_v3, 8  ;;  %v1553_v38 = vpop.trf.xlu0 }
 0x25a   : > { %v1795_v42 = vcombine.low %v1553_v38, %v1585_v37 }
 0x25c   : > { %1698 = vxpose.xlu1.b32.cont [2/16] (narrow) %v1202_v4, 8  ;;  %v1811_v44 = vrot.slane %v1795_v42, %v3117_v30 }
 0x25d   : > { %1666 = vxpose.xlu0.b32.cont [2/16] (narrow) %v1186_v5, 8 }
 0x25e   : > { %v1826_v49 = vcombine.low %v1804_v43, %v1811_v44  ;;  %v1864_v50 = vcombine.high %v1804_v43, %v1811_v44 }
 0x260   : > { %1699 = vxpose.xlu1.b32.cont [3/16] (narrow) %v1203_v6, 8  ;;  %v1834_v55 = vrot.slane %v1826_v49, %v3117_v30  ;;  %v1872_v56 = vrot.slane %v1864_v50, %v3117_v30 }
 0x261   : > { %1667 = vxpose.xlu0.b32.cont [3/16] (narrow) %v1187_v7, 8 }
 0x264   : > { %1700 = vxpose.xlu1.b32.cont [4/16] (narrow) %v1204_v8, 8 }
 0x265   : > { %1668 = vxpose.xlu0.b32.cont [4/16] (narrow) %v1188_v9, 8 }
 0x268   : > { %1701 = vxpose.xlu1.b32.cont [5/16] (narrow) %v1205_v10, 8 }
 0x269   : > { %1669 = vxpose.xlu0.b32.cont [5/16] (narrow) %v1189_v11, 8 }
 0x26c   : > { %1702 = vxpose.xlu1.b32.cont [6/16] (narrow) %v1206_v12, 8 }
 0x26d   : > { %1670 = vxpose.xlu0.b32.cont [6/16] (narrow) %v1190_v13, 8 }
 0x270   : > { %1703 = vxpose.xlu1.b32.cont [7/16] (narrow) %v1207_v14, 8 }
 0x271   : > { %1671 = vxpose.xlu0.b32.cont [7/16] (narrow) %v1191_v15, 8 }
 0x274   : > { %1704 = vxpose.xlu1.b32.cont [8/16] (narrow) %v1208_v16, 8 }
 0x275   : > { %1672 = vxpose.xlu0.b32.cont [8/16] (narrow) %v1192_v17, 8 }
 0x278   : > { %1705 = vxpose.xlu1.b32.cont [9/16] (narrow) %v1209_v18, 8 }
 0x279   : > { %1673 = vxpose.xlu0.b32.cont [9/16] (narrow) %v1193_v19, 8 }
 0x27c   : > { %1706 = vxpose.xlu1.b32.cont [10/16] (narrow) %v1210_v20, 8 }
 0x27d   : > { %1674 = vxpose.xlu0.b32.cont [10/16] (narrow) %v1194_v21, 8 }
 0x280   : > { %1707 = vxpose.xlu1.b32.cont [11/16] (narrow) %v1211_v22, 8 }
 0x281   : > { %1675 = vxpose.xlu0.b32.cont [11/16] (narrow) %v1195_v23, 8 }
 0x284   : > { %1708 = vxpose.xlu1.b32.cont [12/16] (narrow) %v1212_v24, 8 }
 0x285   : > { %1676 = vxpose.xlu0.b32.cont [12/16] (narrow) %v1196_v25, 8 }
 0x288   : > { %1709 = vxpose.xlu1.b32.cont [13/16] (narrow) %v1213_v26, 8 }
 0x289   : > { %1677 = vxpose.xlu0.b32.cont [13/16] (narrow) %v1197_v27, 8 }
 0x28c   : > { %1710 = vxpose.xlu1.b32.cont [14/16] (narrow) %v1214_v28, 8 }
 0x28d   : > { %1678 = vxpose.xlu0.b32.cont [14/16] (narrow) %v1198_v29, 8 }
 0x290   : > { %1711 = vxpose.xlu1.b32.cont [15/16] (narrow) %v1215_v31, 8 }
 0x291   : > { %1679 = vxpose.xlu0.b32.cont [15/16] (narrow) %v1199_v32, 8 }
 0x294   : > { %1712 = vxpose.xlu1.b32.end [16/16] (narrow) %v1216_v33, 8 }
 0x295   : > { %1680 = vxpose.xlu0.b32.end [16/16] (narrow) %v1200_v34, 8 }
 0x298   : > { %v1649_v39 = vpop.trf.xlu1 }
 0x299   : > { %v1617_v40 = vpop.trf.xlu0 }
 0x29a   : > { %v1796_v45 = vcombine.low %v1617_v40, %v1649_v39 }
 0x29c   : > { %v1818_v51 = vrot.slane %v1796_v45, %v3117_v30 }
 0x2d8   : > { %v1713_v46 = vpop.trf.xlu1 }
 0x2d9   : > { %v1681_v47 = vpop.trf.xlu0 }
 0x2da   : > { %v1797_v48 = vcombine.low %v1681_v47, %v1713_v46 }
 0x2dc   : > { %v1825_v52 = vrot.slane %v1797_v48, %v3117_v30 }
 0x2de   : > { %v1827_v53 = vcombine.low %v1818_v51, %v1825_v52  ;;  %v1865_v54 = vcombine.high %v1818_v51, %v1825_v52 }
 0x2e0   : > { %v1841_v57 = vrot.slane %v1827_v53, %v3117_v30  ;;  %v1879_v58 = vrot.slane %v1865_v54, %v3117_v30 }
 0x2e2   : > { %v1886_v59 = vcombine.high %v1834_v55, %v1841_v57  ;;  %v1880_v60 = vcombine.low %v1872_v56, %v1879_v58  ;;  %v1842_v61 = vcombine.low %v1834_v55, %v1841_v57 }
 0x2e4   : > { %1884 = vst [vmem:[%s3130_s5 + $0x8] sm:$0xff] %v1880_v60  ;;  %1846 = vst [vmem:[%s3133_s6 + $0x8] sm:$0xff] %v1842_v61  ;;  %s2144_s5 = scalar_lea.vmem %s2143_s26, 512 }
 0x2e5   : > { %1890 = vst [vmem:[%s3136_s7 + $0x8] sm:$0xff] %v1886_v59  ;;  %p2146_p1 = scmp.lt.s32.totalorder %s2144_s5, %s2138_s19 }
 0x2e7   : > { %p2147_p2 = por %p2146_p1, %p2145_p0 }
 0x2e9   : > { %p2148_p3 = pnand %p2147_p2, %p2141_p13 }
 0x2eb   : > { %2151 = shalt.err (!%p2148_p3)
}
 0x2ec   : > { %s2152_s24 = scalar_lea.hbm %s3154_s16, 256  ;;  %s2156_s8 = scalar_lea.hbm %s3268_s2, 512 }
 0x2ed   : > { %p2153_p4 = scmp.ne.s32.totalorder %s3154_s16, %s2152_s24  ;;  %p2157_p9 = scmp.lt.u32.totalorder %s3154_s16, %s3268_s2 }
 0x2ee   : > { %p2158_p10 = scmp.lt.u32.totalorder %s2156_s8, %s2152_s24  ;;  %p2160_p12 = scmp.lt.u32.totalorder %s2152_s24, %s3154_s16 }
 0x2ef   : > { %p2154_p7 = pnand %p2153_p4, %p2327_p5 }
 0x2f0   : > { %p2159_p11 = por %p2158_p10, %p2157_p9 }
 0x2f1   : > { %p2155_p8 = pneg %p2154_p7 }
 0x2f2   : > { %p2161_p13 = por %p2160_p12, %p2159_p11 }
 0x2f4   : > { %p2162_p0 = pnand %p2161_p13, %p2155_p8 }
 0x2f6   : > { %2165 = shalt.err (!%p2162_p0)
}
 0x2f7   : > { %2088 = dma.vmem_to_hbm [thread:$0]  (%p2327_p5), %s3157_s9, 256, %s3154_s16, %s3178_s11  }
 0x2f8   : > { %s1892_s19 = scalar_lea.sflag [#allocation4], %s166_s30  ;;  %s2166_s25 = scalar_lea.vmem %s3165_s10, 256 }
 0x2f9   : > { %p2167_p1 = scmp.ne.s32.totalorder %s3165_s10, %s2166_s25  ;;  %s2265_s26 = smov [#allocation3]  }
 0x2fa   : > { %s2170_s5 = sshll.u32 %s2265_s26, 4  ;;  %s2171_s5 = int_to_ptr.vmem [resolvable:$false] %s2170_s5 }
 0x2fb   : > { %p2168_p2 = pnand %p2167_p1, %p2327_p5  ;;  %s2172_s24 = scalar_lea.vmem %s2171_s5, 512 }
 0x2fc   : > { %p2173_p4 = scmp.lt.s32.totalorder %s3165_s10, %s2171_s5  ;;  %p2174_p7 = scmp.lt.s32.totalorder %s2172_s24, %s2166_s25 }
 0x2fd   : > { %p2169_p3 = pneg %p2168_p2 }
 0x2fe   : > { %p2175_p8 = por %p2174_p7, %p2173_p4 }
 0x300   : > { %p2176_p9 = pnand %p2175_p8, %p2169_p3 }
 0x302   : > { %2179 = shalt.err (!%p2176_p9)
}
 0x303   : > { %s2180_s30 = scalar_lea.hbm %s3163_s27, 256  ;;  %s2184_s6 = scalar_lea.hbm %s3267_s1, 512 }
 0x304   : > { %p2181_p10 = scmp.ne.s32.totalorder %s3163_s27, %s2180_s30  ;;  %p2185_p13 = scmp.lt.u32.totalorder %s3163_s27, %s3267_s1 }
 0x305   : > { %p2186_p0 = scmp.lt.u32.totalorder %s2184_s6, %s2180_s30  ;;  %p2188_p2 = scmp.lt.u32.totalorder %s2180_s30, %s3163_s27 }
 0x306   : > { %p2182_p11 = pnand %p2181_p10, %p2327_p5 }
 0x307   : > { %p2187_p1 = por %p2186_p0, %p2185_p13 }
 0x308   : > { %p2183_p12 = pneg %p2182_p11 }
 0x309   : > { %p2189_p3 = por %p2188_p2, %p2187_p1 }
 0x30b   : > { %p2190_p4 = pnand %p2189_p3, %p2183_p12 }
 0x30d   : > { %2193 = shalt.err (!%p2190_p4)
}
 0x30e   : > { %2087 = dma.vmem_to_hbm [thread:$0]  (%p2327_p5), %s3165_s10, 256, %s3163_s27, %s1892_s19  }
 0x30f   : > { %s2194_s28 = scalar_lea.vmem %s3176_s20, 256  ;;  %s2266_s29 = smov [#allocation7]  }
 0x310   : > { %p2195_p7 = scmp.ne.s32.totalorder %s3176_s20, %s2194_s28  ;;  %s2198_s25 = sshll.u32 %s2266_s29, 4  ;;  %s2199_s25 = int_to_ptr.vmem [resolvable:$false] %s2198_s25 }
 0x311   : > { %s2200_s26 = scalar_lea.vmem %s2199_s25, 512  ;;  %p2201_p10 = scmp.lt.s32.totalorder %s3176_s20, %s2199_s25 }
 0x312   : > { %p2196_p8 = pnand %p2195_p7, %p2327_p5  ;;  %p2202_p11 = scmp.lt.s32.totalorder %s2200_s26, %s2194_s28 }
 0x314   : > { %p2197_p9 = pneg %p2196_p8  ;;  %p2203_p12 = por %p2202_p11, %p2201_p10 }
 0x316   : > { %p2204_p13 = pnand %p2203_p12, %p2197_p9 }
 0x318   : > { %2207 = shalt.err (!%p2204_p13)
}
 0x319   : > { %s2208_s10 = scalar_lea.hbm %s3174_s4, 256  ;;  %s2212_s5 = scalar_lea.hbm %s3269_s3, 512 }
 0x31a   : > { %p2209_p0 = scmp.ne.s32.totalorder %s3174_s4, %s2208_s10  ;;  %p2213_p3 = scmp.lt.u32.totalorder %s3174_s4, %s3269_s3 }
 0x31b   : > { %p2214_p4 = scmp.lt.u32.totalorder %s2212_s5, %s2208_s10  ;;  %p2216_p8 = scmp.lt.u32.totalorder %s2208_s10, %s3174_s4 }
 0x31c   : > { %p2210_p1 = pnand %p2209_p0, %p2327_p5 }
 0x31d   : > { %p2215_p7 = por %p2214_p4, %p2213_p3 }
 0x31e   : > { %p2211_p2 = pneg %p2210_p1 }
 0x31f   : > { %p2217_p9 = por %p2216_p8, %p2215_p7 }
 0x321   : > { %p2218_p10 = pnand %p2217_p9, %p2211_p2 }
 0x323   : > { %2221 = shalt.err (!%p2218_p10)
}
 0x324   : > { %2089 = dma.vmem_to_hbm [thread:$0]  (%p2327_p5), %s3176_s20, 256, %s3174_s4, %s3178_s11  }
 0x325 PF: > { %p2103_p11 = scmp.ge.s32.totalorder %s2260_s15, 2  ;;  %s1956_s9 = sand.u32 1, %s2248_s12  }
 0x326   : > { %s1957_s16 = scalar_lea.sflag [#allocation4], %s1956_s9 }
 0x327   : > { %p2094_p12 = pnand %p2103_p11, %p2331_p6 }
 0x329   : > { %2239 = dma.done.wait (!%p2094_p12), %s1957_s16, 256  }
 0x32a   : > { %2241 = vsyncadd (!%p2094_p12), %s1957_s16, 4294967040  ;;  %s1965_s6 = sand.u32 1, %s2064_s17  }
 0x32b   : > { %s1966_s7 = scalar_lea.sflag [#allocation6], %s1965_s6 }
 0x32c   : > { %2243 = dma.done.wait (!%p2094_p12), %s1966_s7, 512  }
 0x32d   : > { %2245 = vsyncadd (!%p2094_p12), %s1966_s7, 4294966784  ;;  %p17_p5 = scmp.ge.s32.totalorder %s2312_s18, 4   ;;  %s3272_s12 = smov %s2252_s13 }
 0x32e   : > { %s3273_s13 = smov %s2256_s14  ;;  %s3274_s14 = smov %s2325_s21 }
 0x32f   : > { %s3275_s15 = smov %s2312_s18  ;;  %19 = sbr.rel (!%p17_p5) target bundleno = 5 (0x5), region = 91 }
 0x336   :  { %1980 = vsyncpa [#allocation4], 1 }
 0x337   :  { %1982 = vsyncpa [#allocation4 + $0x1], 1 }
 0x338   :  { %1983 = vsyncpa [#allocation6], 1 }
 0x339   :  { %1985 = vsyncpa [#allocation6 + $0x1], 1 }

</bundles_post_ra>
